<compile_context>
chip_gen: v5e
topology: v5e:2x2
jax: 0.10.0
libtpu: 0.0.40
codegen_flags: <defaults>
</compile_context>

<pallas_src>
import functools

import jax
import jax.numpy as jnp
from jax.experimental import pallas as pl
from jax.experimental.pallas import tpu as pltpu


_LANE = 128
_SUB = 8


def _round_up(v, m):
    return ((v + m - 1) // m) * m


def rgcn_kernel(x_tile_ref, x_full_ref, adjs_ref, w_root_ref, w_rel_ref,
                b_rel_ref, wg_ref, bg_ref, out_ref, *, relation_num):
    x_t = x_tile_ref[...]                               # (TM, Fin) f32
    x_f = x_full_ref[...]                               # (Npad, Fin) f32
    w_root = w_root_ref[...]                            # (Fin, Fpad)
    w_rel = w_rel_ref[...]                              # (Fin, Fpad)

    # Shared root transform + rel bias, computed once per node tile.
    root_b = (jnp.dot(x_t, w_root, preferred_element_type=jnp.float32)
              + b_rel_ref[...])                         # (TM, Fpad)

    transforms = []
    for r in range(relation_num):
        adj_r = adjs_ref[r].astype(jnp.float32)         # bf16 0/1 -> f32, lossless
        agg = jnp.dot(adj_r, x_f, preferred_element_type=jnp.float32)
        t = root_b + jnp.dot(agg, w_rel, preferred_element_type=jnp.float32)
        transforms.append(t)

    if relation_num == 1:
        out_ref[...] = transforms[0].astype(out_ref.dtype)
        return

    # Block-wise gate linear (no concat, no sub-128 lane slicing):
    #   gate_r = b_gate_r + sum_s t_s @ Wg[s, r]
    gates = []
    for r in range(relation_num):
        g = bg_ref[r]                                   # (1, Fpad)
        for s in range(relation_num):
            g = g + jnp.dot(transforms[s],
                            wg_ref[s * relation_num + r],
                            preferred_element_type=jnp.float32)
        gates.append(g)

    # Softmax across the relation axis, fused with the gated accumulation.
    m = gates[0]
    for g in gates[1:]:
        m = jnp.maximum(m, g)

    e = jnp.exp(gates[0] - m)
    denom = e
    acc = e * transforms[0]
    for r in range(1, relation_num):
        e = jnp.exp(gates[r] - m)
        denom = denom + e
        acc = acc + e * transforms[r]

    inv = pl.reciprocal(denom, approx=True)             # EUP slot
    inv = inv * (2.0 - denom * inv)                     # Newton step -> f32-accurate
    out_ref[...] = (acc * inv).astype(out_ref.dtype)


def _choose_tiling(n, relation_num, tile_m):
    tm = min(tile_m, _round_up(n, _SUB))
    tm = max(_SUB, _round_up(tm, _SUB))
    n_pad = _round_up(n, tm)
    # Budget the double-buffered bf16 adj tile to ~24 MiB so it fits v7x's
    # 64 MiB VMEM (and the default scoped limit) with headroom.
    while tm > _SUB and 2 * relation_num * tm * n_pad * 2 > 24 * 1024 * 1024:
        tm = max(_SUB, (tm // 2) // _SUB * _SUB)
        n_pad = _round_up(n, tm)
    return tm, n_pad


def rgcn_forward(x, adjs, w_root, w_rel, b_rel, w_gate, b_gate,
                 relation_num, out_features, *, tile_m=256):
    if adjs.ndim == 2:
        adjs = adjs[None, :, :]
    N, Fin = x.shape
    R = relation_num
    Fout = out_features
    Fpad = _round_up(Fout, _LANE)

    TM, N_pad = _choose_tiling(N, R, tile_m)
    grid_m = N_pad // TM

    # ---- pad / repack operands (wrapper-side layout plumbing) ----
    x_p = jnp.pad(x.astype(jnp.float32), ((0, N_pad - N), (0, 0)))
    adjs_p = jnp.pad(adjs.astype(jnp.float32),
                     ((0, 0), (0, N_pad - N), (0, N_pad - N))
                     ).astype(jnp.bfloat16)             # 0/1 -> lossless bf16
    w_root_p = jnp.pad(w_root.astype(jnp.float32), ((0, 0), (0, Fpad - Fout)))
    w_rel_p = jnp.pad(w_rel.astype(jnp.float32), ((0, 0), (0, Fpad - Fout)))
    b_rel_p = jnp.pad(b_rel.reshape(1, Fout).astype(jnp.float32),
                      ((0, 0), (0, Fpad - Fout)))

    if R > 1:
        # Wg[s, r] = w_gate[s*Fout:(s+1)*Fout, r*Fout:(r+1)*Fout], padded.
        wg = w_gate.astype(jnp.float32).reshape(R, Fout, R, Fout)
        wg = jnp.transpose(wg, (0, 2, 1, 3))                       # (s, r, F, F)
        wg = jnp.pad(wg, ((0, 0), (0, 0), (0, Fpad - Fout), (0, Fpad - Fout)))
        wg = wg.reshape(R * R, Fpad, Fpad)
        bg = jnp.pad(b_gate.astype(jnp.float32).reshape(R, 1, Fout),
                     ((0, 0), (0, 0), (0, Fpad - Fout)))
    else:
        wg = jnp.zeros((1, Fpad, Fpad), jnp.float32)
        bg = jnp.zeros((1, 1, Fpad), jnp.float32)

    kernel = functools.partial(rgcn_kernel, relation_num=R)

    # ---- scheduler hint + VMEM budget ----
    flops = (2 * R * N_pad * N_pad * Fin
             + 2 * N_pad * Fin * Fpad
             + 2 * R * N_pad * Fin * Fpad
             + (2 * R * R * N_pad * Fpad * Fpad if R > 1 else 0))
    transcendentals = R * N_pad * Fpad if R > 1 else 0
    bytes_accessed = (adjs_p.size * 2 + x_p.size * 4 + N_pad * Fpad * 4
                      + (w_root_p.size + w_rel_p.size + b_rel_p.size
                         + wg.size + bg.size) * 4)
    cost = pl.CostEstimate(flops=int(flops),
                           transcendentals=int(transcendentals),
                           bytes_accessed=int(bytes_accessed))

    vmem_est = (2 * R * TM * N_pad * 2          # adj tile, bf16, double-buffered
                + 2 * N_pad * Fin * 4           # resident x
                + 2 * TM * Fin * 4              # x row tile
                + 2 * TM * Fpad * 4             # out tile
                + 2 * (w_root_p.size + w_rel_p.size + b_rel_p.size
                       + wg.size + bg.size) * 4
                + (3 * R + 4) * TM * Fpad * 4)  # in-kernel temporaries
    vmem_limit = int(min(64 * 1024 * 1024,
                         max(2 * vmem_est, 8 * 1024 * 1024)))

    out_full = pl.pallas_call(
        kernel,
        out_shape=jax.ShapeDtypeStruct((N_pad, Fpad), jnp.float32),
        grid=(grid_m,),
        in_specs=[
            pl.BlockSpec((TM, Fin), lambda i: (i, 0)),          # x row tile
            pl.BlockSpec((N_pad, Fin), lambda i: (0, 0)),       # x full (resident)
            pl.BlockSpec((R, TM, N_pad), lambda i: (0, i, 0)),  # adj row tile
            pl.BlockSpec((Fin, Fpad), lambda i: (0, 0)),
            pl.BlockSpec((Fin, Fpad), lambda i: (0, 0)),
            pl.BlockSpec((1, Fpad), lambda i: (0, 0)),
            pl.BlockSpec((R * R if R > 1 else 1, Fpad, Fpad), lambda i: (0, 0, 0)),
            pl.BlockSpec((R if R > 1 else 1, 1, Fpad), lambda i: (0, 0, 0)),
        ],
        out_specs=pl.BlockSpec((TM, Fpad), lambda i: (i, 0)),
        compiler_params=pltpu.CompilerParams(
            dimension_semantics=("parallel",),
            vmem_limit_bytes=vmem_limit),
        cost_estimate=cost,
    )(x_p, x_p, adjs_p, w_root_p, w_rel_p, b_rel_p, wg, bg)

    return out_full[:N, :Fout]


def rgcn_reference(x, adjs, w_root, w_rel, b_rel, w_gate, b_gate,
                   relation_num, out_features):
    """Pure-JAX reference mirroring the PyTorch forward."""
    if adjs.ndim == 2:
        adjs = adjs[None, :, :]
    N = x.shape[0]
    transform = []
    for r in range(relation_num):
        agg = adjs[r] @ x
        transform.append(x @ w_root + agg @ w_rel + b_rel[0])
    transform = jnp.stack(transform, axis=1)                     # (N, R, Fout)
    if relation_num == 1:
        return jnp.sum(transform, axis=1)
    gate = (transform.reshape(N, -1) @ w_gate + b_gate[0]).reshape(
        N, relation_num, out_features)
    gate = jax.nn.softmax(gate, axis=1)
    return jnp.sum(gate * transform, axis=1)


if __name__ == "__main__":
    # Small shapes consistent with the module: N nodes, hidden features.
    N = 200           # nodes (non-multiple of the tile -> exercises padding)
    F_IN = 32         # in_features
    F_OUT = 32        # out_features
    R = 2             # relation_num

    key = jax.random.PRNGKey(0)
    k_x, k_adj, k_wroot, k_wrel, k_brel, k_wgate, k_bgate = jax.random.split(key, 7)

    x = jax.random.normal(k_x, (N, F_IN), dtype=jnp.float32)
    adjs = (jax.random.uniform(k_adj, (R, N, N)) > 0.7).astype(jnp.float32)

    # Deterministic Linear-style init: U(-1/sqrt(fan_in), 1/sqrt(fan_in)).
    # nn.ModuleList([module] * R) shares one module across relations, so a
    # single (w_root, w_rel, b_rel) set is used for every relation.
    def uinit(k, shape, fan_in):
        bound = 1.0 / jnp.sqrt(jnp.float32(fan_in))
        return jax.random.uniform(k, shape, jnp.float32, -bound, bound)

    w_root = uinit(k_wroot, (F_IN, F_OUT), F_IN)           # lin_root: no bias
    w_rel = uinit(k_wrel, (F_IN, F_OUT), F_IN)             # lin_rel
    b_rel = uinit(k_brel, (1, F_OUT), F_IN)
    w_gate = uinit(k_wgate, (R * F_OUT, R * F_OUT), R * F_OUT)
    b_gate = uinit(k_bgate, (1, R * F_OUT), R * F_OUT)

    out = rgcn_forward(x, adjs, w_root, w_rel, b_rel, w_gate, b_gate,
                       R, F_OUT, tile_m=128)               # tile_m=128 -> 2-step grid
    out = jax.block_until_ready(out)

    ref = rgcn_reference(x, adjs, w_root, w_rel, b_rel, w_gate, b_gate, R, F_OUT)
    assert out.shape == (N, F_OUT)
    assert jnp.allclose(out, ref, atol=2e-4, rtol=2e-4), "mismatch vs reference"

    print("KERNEL_OK")
</pallas_src>

<mosaic_0001>
module attributes {stable_mosaic.version = 11 : i64} {
  func.func @rgcn_kernel(%arg0: i32, %arg1: memref<128x32xf32, #tpu.memory_space<vmem>>, %arg2: memref<256x32xf32, #tpu.memory_space<vmem>>, %arg3: memref<2x128x256xbf16, #tpu.memory_space<vmem>>, %arg4: memref<32x128xf32, #tpu.memory_space<vmem>>, %arg5: memref<32x128xf32, #tpu.memory_space<vmem>>, %arg6: memref<1x128xf32, #tpu.memory_space<vmem>>, %arg7: memref<4x128x128xf32, #tpu.memory_space<vmem>>, %arg8: memref<2x1x128xf32, #tpu.memory_space<vmem>>, %arg9: memref<128x128xf32, #tpu.memory_space<vmem>>) attributes {dimension_semantics = [#tpu.dimension_semantics<parallel>], iteration_bounds = array<i64: 2>, scalar_prefetch = 0 : i64, scratch_operands = 0 : i64, tpu.core_type = #tpu.core_type<tc>, window_params = [{transform_indices = @transform_0, window_bounds = array<i64: 128, 32>}, {pipeline_mode = #tpu.pipeline_mode<synchronous>, transform_indices = @transform_1, window_bounds = array<i64: 256, 32>}, {transform_indices = @transform_2, window_bounds = array<i64: 2, 128, 256>}, {pipeline_mode = #tpu.pipeline_mode<synchronous>, transform_indices = @transform_3, window_bounds = array<i64: 32, 128>}, {pipeline_mode = #tpu.pipeline_mode<synchronous>, transform_indices = @transform_4, window_bounds = array<i64: 32, 128>}, {pipeline_mode = #tpu.pipeline_mode<synchronous>, transform_indices = @transform_5, window_bounds = array<i64: 1, 128>}, {pipeline_mode = #tpu.pipeline_mode<synchronous>, transform_indices = @transform_6, window_bounds = array<i64: 4, 128, 128>}, {pipeline_mode = #tpu.pipeline_mode<synchronous>, transform_indices = @transform_7, window_bounds = array<i64: 2, 1, 128>}, {transform_indices = @transform_8, window_bounds = array<i64: 128, 128>}]} {
    %c0 = arith.constant 0 : index
    %c0_0 = arith.constant 0 : index
    %0 = vector.load %arg1[%c0, %c0_0] : memref<128x32xf32, #tpu.memory_space<vmem>>, vector<128x32xf32>
    %c0_1 = arith.constant 0 : index
    %c0_2 = arith.constant 0 : index
    %1 = vector.load %arg2[%c0_1, %c0_2] : memref<256x32xf32, #tpu.memory_space<vmem>>, vector<256x32xf32>
    %c0_3 = arith.constant 0 : index
    %c0_4 = arith.constant 0 : index
    %2 = vector.load %arg4[%c0_3, %c0_4] : memref<32x128xf32, #tpu.memory_space<vmem>>, vector<32x128xf32>
    %c0_5 = arith.constant 0 : index
    %c0_6 = arith.constant 0 : index
    %3 = vector.load %arg5[%c0_5, %c0_6] : memref<32x128xf32, #tpu.memory_space<vmem>>, vector<32x128xf32>
    %cst = arith.constant dense<0.000000e+00> : vector<128x128xf32>
    %4 = tpu.matmul %0, %2, %cst {dimension_numbers = #tpu.dot_dimension_numbers<[1], [0], [0], [1], [0, 0, 1, 1], [], []>} : vector<128x32xf32>, vector<32x128xf32>, vector<128x128xf32> -> vector<128x128xf32>
    %c0_7 = arith.constant 0 : index
    %c0_8 = arith.constant 0 : index
    %5 = vector.load %arg6[%c0_7, %c0_8] : memref<1x128xf32, #tpu.memory_space<vmem>>, vector<1x128xf32>
    %6 = vector.broadcast %5 : vector<1x128xf32> to vector<128x128xf32>
    %7 = arith.addf %4, %6 : vector<128x128xf32>
    %c0_9 = arith.constant 0 : index
    %c0_10 = arith.constant 0 : index
    %c0_11 = arith.constant 0 : index
    %8 = vector.load %arg3[%c0_9, %c0_10, %c0_11] : memref<2x128x256xbf16, #tpu.memory_space<vmem>>, vector<1x128x256xbf16>
    %9 = vector.shape_cast %8 : vector<1x128x256xbf16> to vector<128x256xbf16>
    %10 = arith.extf %9 : vector<128x256xbf16> to vector<128x256xf32>
    %cst_12 = arith.constant dense<0.000000e+00> : vector<128x32xf32>
    %11 = tpu.matmul %10, %1, %cst_12 {dimension_numbers = #tpu.dot_dimension_numbers<[1], [0], [0], [1], [0, 0, 1, 1], [], []>} : vector<128x256xf32>, vector<256x32xf32>, vector<128x32xf32> -> vector<128x32xf32>
    %cst_13 = arith.constant dense<0.000000e+00> : vector<128x128xf32>
    %12 = tpu.matmul %11, %3, %cst_13 {dimension_numbers = #tpu.dot_dimension_numbers<[1], [0], [0], [1], [0, 0, 1, 1], [], []>} : vector<128x32xf32>, vector<32x128xf32>, vector<128x128xf32> -> vector<128x128xf32>
    %13 = arith.addf %7, %12 : vector<128x128xf32>
    %c1 = arith.constant 1 : index
    %c0_14 = arith.constant 0 : index
    %c0_15 = arith.constant 0 : index
    %14 = vector.load %arg3[%c1, %c0_14, %c0_15] : memref<2x128x256xbf16, #tpu.memory_space<vmem>>, vector<1x128x256xbf16>
    %15 = vector.shape_cast %14 : vector<1x128x256xbf16> to vector<128x256xbf16>
    %16 = arith.extf %15 : vector<128x256xbf16> to vector<128x256xf32>
    %cst_16 = arith.constant dense<0.000000e+00> : vector<128x32xf32>
    %17 = tpu.matmul %16, %1, %cst_16 {dimension_numbers = #tpu.dot_dimension_numbers<[1], [0], [0], [1], [0, 0, 1, 1], [], []>} : vector<128x256xf32>, vector<256x32xf32>, vector<128x32xf32> -> vector<128x32xf32>
    %cst_17 = arith.constant dense<0.000000e+00> : vector<128x128xf32>
    %18 = tpu.matmul %17, %3, %cst_17 {dimension_numbers = #tpu.dot_dimension_numbers<[1], [0], [0], [1], [0, 0, 1, 1], [], []>} : vector<128x32xf32>, vector<32x128xf32>, vector<128x128xf32> -> vector<128x128xf32>
    %19 = arith.addf %7, %18 : vector<128x128xf32>
    %c0_18 = arith.constant 0 : index
    %c0_19 = arith.constant 0 : index
    %c0_20 = arith.constant 0 : index
    %20 = vector.load %arg8[%c0_18, %c0_19, %c0_20] : memref<2x1x128xf32, #tpu.memory_space<vmem>>, vector<1x1x128xf32>
    %21 = vector.shape_cast %20 : vector<1x1x128xf32> to vector<1x128xf32>
    %c0_21 = arith.constant 0 : index
    %c0_22 = arith.constant 0 : index
    %c0_23 = arith.constant 0 : index
    %22 = vector.load %arg7[%c0_21, %c0_22, %c0_23] : memref<4x128x128xf32, #tpu.memory_space<vmem>>, vector<1x128x128xf32>
    %23 = vector.shape_cast %22 : vector<1x128x128xf32> to vector<128x128xf32>
    %cst_24 = arith.constant dense<0.000000e+00> : vector<128x128xf32>
    %24 = tpu.matmul %13, %23, %cst_24 {dimension_numbers = #tpu.dot_dimension_numbers<[1], [0], [0], [1], [0, 0, 1, 1], [], []>} : vector<128x128xf32>, vector<128x128xf32>, vector<128x128xf32> -> vector<128x128xf32>
    %25 = vector.broadcast %21 : vector<1x128xf32> to vector<128x128xf32>
    %26 = arith.addf %25, %24 : vector<128x128xf32>
    %c2 = arith.constant 2 : index
    %c0_25 = arith.constant 0 : index
    %c0_26 = arith.constant 0 : index
    %27 = vector.load %arg7[%c2, %c0_25, %c0_26] : memref<4x128x128xf32, #tpu.memory_space<vmem>>, vector<1x128x128xf32>
    %28 = vector.shape_cast %27 : vector<1x128x128xf32> to vector<128x128xf32>
    %cst_27 = arith.constant dense<0.000000e+00> : vector<128x128xf32>
    %29 = tpu.matmul %19, %28, %cst_27 {dimension_numbers = #tpu.dot_dimension_numbers<[1], [0], [0], [1], [0, 0, 1, 1], [], []>} : vector<128x128xf32>, vector<128x128xf32>, vector<128x128xf32> -> vector<128x128xf32>
    %30 = arith.addf %26, %29 : vector<128x128xf32>
    %c1_28 = arith.constant 1 : index
    %c0_29 = arith.constant 0 : index
    %c0_30 = arith.constant 0 : index
    %31 = vector.load %arg8[%c1_28, %c0_29, %c0_30] : memref<2x1x128xf32, #tpu.memory_space<vmem>>, vector<1x1x128xf32>
    %32 = vector.shape_cast %31 : vector<1x1x128xf32> to vector<1x128xf32>
    %c1_31 = arith.constant 1 : index
    %c0_32 = arith.constant 0 : index
    %c0_33 = arith.constant 0 : index
    %33 = vector.load %arg7[%c1_31, %c0_32, %c0_33] : memref<4x128x128xf32, #tpu.memory_space<vmem>>, vector<1x128x128xf32>
    %34 = vector.shape_cast %33 : vector<1x128x128xf32> to vector<128x128xf32>
    %cst_34 = arith.constant dense<0.000000e+00> : vector<128x128xf32>
    %35 = tpu.matmul %13, %34, %cst_34 {dimension_numbers = #tpu.dot_dimension_numbers<[1], [0], [0], [1], [0, 0, 1, 1], [], []>} : vector<128x128xf32>, vector<128x128xf32>, vector<128x128xf32> -> vector<128x128xf32>
    %36 = vector.broadcast %32 : vector<1x128xf32> to vector<128x128xf32>
    %37 = arith.addf %36, %35 : vector<128x128xf32>
    %c3 = arith.constant 3 : index
    %c0_35 = arith.constant 0 : index
    %c0_36 = arith.constant 0 : index
    %38 = vector.load %arg7[%c3, %c0_35, %c0_36] : memref<4x128x128xf32, #tpu.memory_space<vmem>>, vector<1x128x128xf32>
    %39 = vector.shape_cast %38 : vector<1x128x128xf32> to vector<128x128xf32>
    %cst_37 = arith.constant dense<0.000000e+00> : vector<128x128xf32>
    %40 = tpu.matmul %19, %39, %cst_37 {dimension_numbers = #tpu.dot_dimension_numbers<[1], [0], [0], [1], [0, 0, 1, 1], [], []>} : vector<128x128xf32>, vector<128x128xf32>, vector<128x128xf32> -> vector<128x128xf32>
    %41 = arith.addf %37, %40 : vector<128x128xf32>
    %42 = arith.maximumf %30, %41 : vector<128x128xf32>
    %43 = arith.subf %30, %42 : vector<128x128xf32>
    %44 = math.exp %43 : vector<128x128xf32>
    %45 = arith.mulf %44, %13 : vector<128x128xf32>
    %46 = arith.subf %41, %42 : vector<128x128xf32>
    %47 = math.exp %46 : vector<128x128xf32>
    %48 = arith.addf %44, %47 : vector<128x128xf32>
    %49 = arith.mulf %47, %19 : vector<128x128xf32>
    %50 = arith.addf %45, %49 : vector<128x128xf32>
    %51 = tpu.reciprocal %48 {approx = true} : vector<128x128xf32> -> vector<128x128xf32>
    %52 = arith.mulf %48, %51 : vector<128x128xf32>
    %cst_38 = arith.constant 2.000000e+00 : f32
    %53 = vector.broadcast %cst_38 : f32 to vector<128x128xf32>
    %54 = arith.subf %53, %52 : vector<128x128xf32>
    %55 = arith.mulf %51, %54 : vector<128x128xf32>
    %56 = arith.mulf %50, %55 : vector<128x128xf32>
    %c0_39 = arith.constant 0 : index
    %c0_40 = arith.constant 0 : index
    %57 = vector.load %arg9[%c0_39, %c0_40] : memref<128x128xf32, #tpu.memory_space<vmem>>, vector<128x128xf32>
    tpu.vector_store %arg9[%c0_39, %c0_40], %56 {strides = array<i32>} : memref<128x128xf32, #tpu.memory_space<vmem>>, vector<128x128xf32>,
    return
  }
  func.func @transform_0(%arg0: i32) -> (i32, i32) {
    %c0_i32 = arith.constant 0 : i32
    %c0_i32_0 = arith.constant 0 : i32
    return %arg0, %c0_i32 : i32, i32
  }
  func.func @transform_1(%arg0: i32) -> (i32, i32) {
    %c0_i32 = arith.constant 0 : i32
    %c0_i32_0 = arith.constant 0 : i32
    %c0_i32_1 = arith.constant 0 : i32
    return %c0_i32, %c0_i32_0 : i32, i32
  }
  func.func @transform_2(%arg0: i32) -> (i32, i32, i32) {
    %c0_i32 = arith.constant 0 : i32
    %c0_i32_0 = arith.constant 0 : i32
    %c0_i32_1 = arith.constant 0 : i32
    return %c0_i32, %arg0, %c0_i32_0 : i32, i32, i32
  }
  func.func @transform_3(%arg0: i32) -> (i32, i32) {
    %c0_i32 = arith.constant 0 : i32
    %c0_i32_0 = arith.constant 0 : i32
    %c0_i32_1 = arith.constant 0 : i32
    return %c0_i32, %c0_i32_0 : i32, i32
  }
  func.func @transform_4(%arg0: i32) -> (i32, i32) {
    %c0_i32 = arith.constant 0 : i32
    %c0_i32_0 = arith.constant 0 : i32
    %c0_i32_1 = arith.constant 0 : i32
    return %c0_i32, %c0_i32_0 : i32, i32
  }
  func.func @transform_5(%arg0: i32) -> (i32, i32) {
    %c0_i32 = arith.constant 0 : i32
    %c0_i32_0 = arith.constant 0 : i32
    %c0_i32_1 = arith.constant 0 : i32
    return %c0_i32, %c0_i32_0 : i32, i32
  }
  func.func @transform_6(%arg0: i32) -> (i32, i32, i32) {
    %c0_i32 = arith.constant 0 : i32
    %c0_i32_0 = arith.constant 0 : i32
    %c0_i32_1 = arith.constant 0 : i32
    %c0_i32_2 = arith.constant 0 : i32
    return %c0_i32, %c0_i32_0, %c0_i32_1 : i32, i32, i32
  }
  func.func @transform_7(%arg0: i32) -> (i32, i32, i32) {
    %c0_i32 = arith.constant 0 : i32
    %c0_i32_0 = arith.constant 0 : i32
    %c0_i32_1 = arith.constant 0 : i32
    %c0_i32_2 = arith.constant 0 : i32
    return %c0_i32, %c0_i32_0, %c0_i32_1 : i32, i32, i32
  }
  func.func @transform_8(%arg0: i32) -> (i32, i32) {
    %c0_i32 = arith.constant 0 : i32
    %c0_i32_0 = arith.constant 0 : i32
    return %arg0, %c0_i32 : i32, i32
  }
}

</mosaic_0001>

<bundles_post_ra>
// kernel: tpu_custom_call.1
= control target key start
LH: loop header
LB: loop body
LE: loop exit
PB: predicated region body
PF: predicated region fallthrough
CT: control target
= control target key end

     0   :  { %13 = vsyncpa [#allocation4], 0  ;;  %s3510_s0 = inlined_call_operand.vmem [shape: f32[256,32], index: 0, kind: input, shape index: {}]   ;;  %s3511_s1 = inlined_call_operand.vmem [shape: f32[256,32], index: 1, kind: input, shape index: {}]   ;;  %s3512_s2 = inlined_call_operand.vmem [shape: bf16[2,256,256], index: 2, kind: input, shape index: {}]   ;;  %s3513_s3 = inlined_call_operand.vmem [shape: f32[32,128], index: 3, kind: input, shape index: {}]   ;;  %s3514_s4 = inlined_call_operand.vmem [shape: f32[32,128], index: 4, kind: input, shape index: {}]   ;;  %s3515_s5 = inlined_call_operand.vmem [shape: f32[1,128], index: 5, kind: input, shape index: {}]   ;;  %s3516_s6 = inlined_call_operand.hbm [shape: f32[4,128,128], index: 6, kind: input, shape index: {}]   ;;  %s3517_s7 = inlined_call_operand.vmem [shape: f32[2,1,128], index: 7, kind: input, shape index: {}]   ;;  %s3518_s8 = inlined_call_operand.hbm [shape: f32[256,128], index: 8, kind: output, shape index: {}]  }
   0x1   :  { %14 = vsyncpa [#allocation5], 0 }
   0x2   :  { %16 = vsyncpa [#allocation5 + $0x1], 0  ;;  %s2511_s27 = smov 0   ;;  %s2513_s28 = smov 0  }
   0x3   :  { %s2515_s29 = smov 0   ;;  %s2517_s30 = smov 0  }
   0x4 LB: > { %s2532_s9 = sadd.s32 4294967295, %s2459_s30   ;;  %s2075_s10 = sadd.s32 4294967294, %s2459_s30   ;;  %s2459_s30 = sphi %s2517_s30, %s3538_s30   ;;  %s2455_s29 = sphi %s2515_s29, %s3537_s29   ;;  %s2451_s28 = sphi %s2513_s28, %s3536_s28   ;;  %s2447_s27 = sphi %s2511_s27, %s3535_s27  }
   0x5   : > { %s2536_s11 = sadd.s32 1, %s2459_s30   ;;  %s76_s12 = sadd.s32 1, %s2455_s29 }
   0x6   : > { %s73_s13 = ssub.s32 %s2459_s30, %s2536_s11  ;;  %p83_p0 = scmp.ne.s32.totalorder %s2455_s29, %s2451_s28 }
   0x7   : > { %p74_p1 = scmp.eq.s32.totalorder %s73_s13, 0  ;;  %p84_p2 = scmp.eq.s32.totalorder %s2459_s30, 0 }
   0x8   : > { %p218_p3 = scmp.eq.s32.totalorder %s2532_s9, 1  ;;  %p223_p4 = scmp.ne.s32.totalorder %s2451_s28, %s2447_s27 }
   0x9   : > { %s2548_s14 = scalar_select %p74_p1, %s2455_s29, %s76_s12  }
   0xa   : > { %p2550_p5 = por %p84_p2, %p83_p0  ;;  %p2554_p6 = por %p218_p3, %p83_p0 }
   0xb   : > { %p224_p7 = scmp.eq.s32.totalorder %s2075_s10, 1  ;;  %p2076_p8 = scmp.ge.s32.totalorder %s2459_s30, 1 }
   0xc   : > { %p231_p9 = scmp.lt.s32.totalorder %s2459_s30, 3  ;;  %p2224_p11 = scmp.eq.s32.totalorder %s2532_s9, 0 }
   0xd   : > { %p2560_p10 = por %p224_p7, %p223_p4  ;;  %s254_s21 = sshll.u32 %s3516_s6, 4  ;;  %s255_s21 = int_to_ptr.hbm [resolvable:$true] %s254_s21 }
   0xe   : > { %p2565_p12 = pnand %p2076_p8, %p231_p9  ;;  %s2461_s22 = smov [#allocation3]  }
   0xf   : > { %s256_s23 = sshll.u32 %s2461_s22, 4  ;;  %s2462_s24 = smov 128   ;;  %s257_s23 = int_to_ptr.vmem [resolvable:$true] %s256_s23 }
  0x10   : > { %p2216_p13 = pneg %p2565_p12  ;;  %s2463_s25 = smov 8  }
  0x11   : > { %p2078_p1 = scmp.ge.s32.totalorder %s2459_s30, 2 }
  0x12   : > { %p2217_p0 = pnand %p2224_p11, %p2216_p13 }
  0x13   : > { %269 = sbr.rel (%p2078_p1) target bundleno = 60 (0x3c), region = 40 }
  0x14   : > { %2219 = dma.hbm_to_vmem [thread:$0]  (!%p2217_p0), %s255_s21, 8192, %s257_s23, [#allocation4], %s2462_s24, %s2462_s24, %s2463_s25  }
  0x18   : > { %281 = sbr.rel (!%p2550_p5) target bundleno = 60 (0x3c), region = 48  ;;  %s283_s26 = sand.u32 (%p2550_p5), 1, %s2455_s29  }
  0x19   : > { %s2160_s10 = sshll.u32 (%p2550_p5), %s2459_s30, 7  ;;  %s2079_s12 = sshll.u32 (%p2550_p5), %s283_s26, 8 }
  0x1a   : > { %s2586_s20 = scalar_lea.vmem (%p2550_p5), %s3512_s2, %s2160_s10  ;;  %s2591_s15 = scalar_lea.vmem (%p2550_p5), [#allocation2], %s2079_s12 }
  0x1b   : > { %v380_v0 = vld [vmem:[%s2586_s20] sm:$0xff] (%p2550_p5)  ;;  %v382_v1 = vld [vmem:[%s2586_s20 + $0x8] sm:$0xff] (%p2550_p5)  ;;  %v384_v2 = vld [vmem:[%s2586_s20 + $0x10] sm:$0xff] (%p2550_p5) }
  0x1c   : > { %381 = vst [vmem:[%s2591_s15] sm:$0xff] (%p2550_p5), %v380_v0  ;;  %v386_v3 = vld [vmem:[%s2586_s20 + $0x18] sm:$0xff] (%p2550_p5)  ;;  %v388_v4 = vld [vmem:[%s2586_s20 + $0x20] sm:$0xff] (%p2550_p5)  ;;  %v390_v5 = vld [vmem:[%s2586_s20 + $0x28] sm:$0xff] (%p2550_p5) }
  0x1d   : > { %383 = vst [vmem:[%s2591_s15 + $0x8] sm:$0xff] %v382_v1  ;;  %v392_v6 = vld [vmem:[%s2586_s20 + $0x30] sm:$0xff]  ;;  %v394_v7 = vld [vmem:[%s2586_s20 + $0x38] sm:$0xff]  ;;  %v396_v8 = vld [vmem:[%s2586_s20 + $0x40] sm:$0xff] }
  0x1e   : > { %385 = vst [vmem:[%s2591_s15 + $0x10] sm:$0xff] %v384_v2  ;;  %v398_v9 = vld [vmem:[%s2586_s20 + $0x48] sm:$0xff]  ;;  %v400_v10 = vld [vmem:[%s2586_s20 + $0x50] sm:$0xff]  ;;  %v402_v11 = vld [vmem:[%s2586_s20 + $0x58] sm:$0xff] }
  0x1f   : > { %387 = vst [vmem:[%s2591_s15 + $0x18] sm:$0xff] %v386_v3  ;;  %v404_v12 = vld [vmem:[%s2586_s20 + $0x60] sm:$0xff]  ;;  %v406_v13 = vld [vmem:[%s2586_s20 + $0x68] sm:$0xff]  ;;  %v408_v14 = vld [vmem:[%s2586_s20 + $0x70] sm:$0xff] }
  0x20   : > { %389 = vst [vmem:[%s2591_s15 + $0x20] sm:$0xff] %v388_v4  ;;  %v410_v15 = vld [vmem:[%s2586_s20 + $0x78] sm:$0xff]  ;;  %v412_v16 = vld [vmem:[%s2586_s20 + $0x100] sm:$0xff]  ;;  %v414_v17 = vld [vmem:[%s2586_s20 + $0x108] sm:$0xff] }
  0x21   : > { %391 = vst [vmem:[%s2591_s15 + $0x28] sm:$0xff] %v390_v5  ;;  %v416_v18 = vld [vmem:[%s2586_s20 + $0x110] sm:$0xff]  ;;  %v418_v19 = vld [vmem:[%s2586_s20 + $0x118] sm:$0xff]  ;;  %v420_v20 = vld [vmem:[%s2586_s20 + $0x120] sm:$0xff] }
  0x22   : > { %393 = vst [vmem:[%s2591_s15 + $0x30] sm:$0xff] %v392_v6  ;;  %v422_v21 = vld [vmem:[%s2586_s20 + $0x128] sm:$0xff]  ;;  %v424_v22 = vld [vmem:[%s2586_s20 + $0x130] sm:$0xff]  ;;  %v426_v23 = vld [vmem:[%s2586_s20 + $0x138] sm:$0xff] }
  0x23   : > { %395 = vst [vmem:[%s2591_s15 + $0x38] sm:$0xff] %v394_v7  ;;  %v428_v24 = vld [vmem:[%s2586_s20 + $0x140] sm:$0xff]  ;;  %v430_v25 = vld [vmem:[%s2586_s20 + $0x148] sm:$0xff]  ;;  %v432_v26 = vld [vmem:[%s2586_s20 + $0x150] sm:$0xff] }
  0x24   : > { %397 = vst [vmem:[%s2591_s15 + $0x40] sm:$0xff] %v396_v8  ;;  %v434_v27 = vld [vmem:[%s2586_s20 + $0x158] sm:$0xff]  ;;  %v436_v28 = vld [vmem:[%s2586_s20 + $0x160] sm:$0xff]  ;;  %v438_v29 = vld [vmem:[%s2586_s20 + $0x168] sm:$0xff] }
  0x25   : > { %399 = vst [vmem:[%s2591_s15 + $0x48] sm:$0xff] %v398_v9  ;;  %v440_v30 = vld [vmem:[%s2586_s20 + $0x170] sm:$0xff]  ;;  %v442_v31 = vld [vmem:[%s2586_s20 + $0x178] sm:$0xff] }
  0x26   : > { %401 = vst [vmem:[%s2591_s15 + $0x50] sm:$0xff] %v400_v10 }
  0x27   : > { %403 = vst [vmem:[%s2591_s15 + $0x58] sm:$0xff] %v402_v11 }
  0x28   : > { %405 = vst [vmem:[%s2591_s15 + $0x60] sm:$0xff] %v404_v12 }
  0x29   : > { %407 = vst [vmem:[%s2591_s15 + $0x68] sm:$0xff] %v406_v13 }
  0x2a   : > { %409 = vst [vmem:[%s2591_s15 + $0x70] sm:$0xff] %v408_v14 }
  0x2b   : > { %411 = vst [vmem:[%s2591_s15 + $0x78] sm:$0xff] %v410_v15 }
  0x2c   : > { %413 = vst [vmem:[%s2591_s15 + $0x80] sm:$0xff] %v412_v16 }
  0x2d   : > { %415 = vst [vmem:[%s2591_s15 + $0x88] sm:$0xff] %v414_v17 }
  0x2e   : > { %417 = vst [vmem:[%s2591_s15 + $0x90] sm:$0xff] %v416_v18 }
  0x2f   : > { %419 = vst [vmem:[%s2591_s15 + $0x98] sm:$0xff] %v418_v19 }
  0x30   : > { %421 = vst [vmem:[%s2591_s15 + $0xa0] sm:$0xff] %v420_v20 }
  0x31   : > { %423 = vst [vmem:[%s2591_s15 + $0xa8] sm:$0xff] %v422_v21 }
  0x32   : > { %425 = vst [vmem:[%s2591_s15 + $0xb0] sm:$0xff] %v424_v22 }
  0x33   : > { %427 = vst [vmem:[%s2591_s15 + $0xb8] sm:$0xff] %v426_v23 }
  0x34   : > { %429 = vst [vmem:[%s2591_s15 + $0xc0] sm:$0xff] %v428_v24 }
  0x35   : > { %431 = vst [vmem:[%s2591_s15 + $0xc8] sm:$0xff] %v430_v25 }
  0x36   : > { %433 = vst [vmem:[%s2591_s15 + $0xd0] sm:$0xff] %v432_v26 }
  0x37   : > { %435 = vst [vmem:[%s2591_s15 + $0xd8] sm:$0xff] %v434_v27 }
  0x38   : > { %437 = vst [vmem:[%s2591_s15 + $0xe0] sm:$0xff] %v436_v28 }
  0x39   : > { %439 = vst [vmem:[%s2591_s15 + $0xe8] sm:$0xff] %v438_v29 }
  0x3a   : > { %441 = vst [vmem:[%s2591_s15 + $0xf0] sm:$0xff] %v440_v30 }
  0x3b   : > { %443 = vst [vmem:[%s2591_s15 + $0xf8] sm:$0xff] %v442_v31 }
  0x3c PF: > { %452 = sbr.rel (%p2565_p12) target bundleno = 972 (0x3cc), region = 86 }
  0x41   : > { %s2657_s21 = sand.u32 1, %s2451_s28  }
  0x42   : > { %s2084_s22 = sshll.u32 %s2657_s21, 8 }
  0x43   : > { %s2660_s23 = scalar_lea.vmem [#allocation2], %s2084_s22 }
  0x44   : > { %2438 = dma.done.wait (%p2224_p11), [#allocation4], 8192  }
  0x45   : > { %2440 = vsyncadd (%p2224_p11), [#allocation4], 4294959104  ;;  %v2669_v32 = vld [vmem:[%s3511_s1 + $0x78] sm:$0xff]  ;;  %v2674_v33 = vld [vmem:[%s3511_s1 + $0x70] sm:$0xff]  ;;  %s2087_s15 = sshll.u32 %s2532_s9, 4  ;;  %vm566_vm0 = vcmask 261120  }
  0x46   : > { %2162 = vmatpush.msra.mxu2 %v2669_v32  ;;  %728 = vmatpush.msra.mxu1 %v2669_v32  ;;  %v2681_v34 = vld [vmem:[%s3511_s1 + $0x68] sm:$0xff]  ;;  %v2688_v35 = vld [vmem:[%s3511_s1 + $0x60] sm:$0xff]  ;;  %v2695_v36 = vld [vmem:[%s3511_s1 + $0x58] sm:$0xff]  ;;  %p499_p2 = scmp.lt.s32.totalorder %s2087_s15, 31  ;;  %s2161_s10 = sshll.u32 %s2532_s9, 7 }
  0x47   : > { %v2702_v37 = vld [vmem:[%s3511_s1 + $0x50] sm:$0xff]  ;;  %v2709_v38 = vld [vmem:[%s3511_s1 + $0x48] sm:$0xff]  ;;  %v2716_v39 = vld [vmem:[%s3511_s1 + $0x40] sm:$0xff]  ;;  %s1979_s20 = scalar_lea.hbm %s3518_s8, %s2161_s10  ;;  %s1968_s9 = scalar_lea.sflag [#allocation5], %s2657_s21 }
  0x48   : > { %2163 = vmatpush.msra.mxu2 %v2674_v33  ;;  %729 = vmatpush.msra.mxu1 %v2674_v33  ;;  %v2723_v40 = vld [vmem:[%s3511_s1 + $0x38] sm:$0xff]  ;;  %v2730_v41 = vld [vmem:[%s3511_s1 + $0x30] sm:$0xff]  ;;  %v2737_v42 = vld [vmem:[%s3511_s1 + $0x28] sm:$0xff]  ;;  %s3540_s15 = smov (!%p499_p2, %s2087_s15), 31  ;;  %s1982_s22 = sshll.u32 %s1979_s20, 4  ;;  %s1983_s22 = int_to_ptr.hbm [resolvable:$true] %s1982_s22 }
  0x49   : > { %v2744_v43 = vld [vmem:[%s3511_s1 + $0x20] sm:$0xff]  ;;  %v2751_v44 = vld [vmem:[%s3511_s1 + $0x18] sm:$0xff]  ;;  %v2758_v45 = vld [vmem:[%s3511_s1 + $0x10] sm:$0xff]  ;;  %s2088_s12 = sshll.u32 %s3540_s15, 3  ;;  %s2086_s15 = sshll.u32 %s2657_s21, 7 }
  0x4a   : > { %2164 = vmatpush.msra.mxu2 %v2681_v34  ;;  %730 = vmatpush.msra.mxu1 %v2681_v34  ;;  %v2762_v46 = vld [vmem:[%s2660_s23 + $0x58] sm:$0xff]  ;;  %v2768_v47 = vld [vmem:[%s3511_s1 + $0x8] sm:$0xff]  ;;  %v2775_v48 = vld [vmem:[%s3511_s1] sm:$0xff]  ;;  %s2934_s26 = scalar_lea.vmem %s3510_s0, %s2088_s12 }
  0x4b   : > { %v718_v49 = vunpack.c.l.bf16 %v2762_v46  ;;  %v2783_v50 = vld [vmem:[%s3511_s1 + $0xf8] sm:$0xff]  ;;  %v2790_v51 = vld [vmem:[%s3511_s1 + $0xf0] sm:$0xff]  ;;  %v2794_v52 = vld [vmem:[%s2660_s23 + $0x60] sm:$0xff] }
  0x4c   : > { %2165 = vmatpush.msra.mxu2 %v2688_v35  ;;  %731 = vmatpush.msra.mxu1 %v2688_v35  ;;  %v2799_v53 = vld [vmem:[%s3511_s1 + $0xe8] sm:$0xff]  ;;  %v720_v54 = vunpack.c.l.bf16 %v2794_v52  ;;  %v2806_v55 = vld [vmem:[%s3511_s1 + $0xe0] sm:$0xff]  ;;  %v2812_v56 = vld [vmem:[%s3511_s1 + $0xd8] sm:$0xff] }
  0x4d   : > { %v680_v57 = vld [vmem:[%s2660_s23] sm:$0xff]  ;;  %v2819_v58 = vld [vmem:[%s3511_s1 + $0xd0] sm:$0xff]  ;;  %v2823_v60 = vld [vmem:[%s2660_s23 + $0x68] sm:$0xff] }
  0x4e   : > { %2166 = vmatpush.msra.mxu2 %v2695_v36  ;;  %732 = vmatpush.msra.mxu1 %v2695_v36  ;;  %v696_v59 = vunpack.c.l.bf16 %v680_v57  ;;  %v2828_v61 = vld [vmem:[%s3511_s1 + $0xc8] sm:$0xff]  ;;  %v722_v62 = vunpack.c.l.bf16 %v2823_v60  ;;  %v2835_v63 = vld [vmem:[%s3511_s1 + $0xc0] sm:$0xff]  ;;  %v2841_v0 = vld [vmem:[%s3511_s1 + $0xb8] sm:$0xff]  ;;  %v697_v18 = vunpack.c.h.bf16 %v680_v57 }
  0x4f   : > { %v681_v1 = vld [vmem:[%s2660_s23 + $0x8] sm:$0xff]  ;;  %v2848_v2 = vld [vmem:[%s3511_s1 + $0xb0] sm:$0xff]  ;;  %v2864_v7 = vld [vmem:[%s3511_s1 + $0xa0] sm:$0xff] }
  0x50   : > { %2167 = vmatpush.msra.mxu2 %v2702_v37  ;;  %733 = vmatpush.msra.mxu1 %v2702_v37  ;;  %v698_v3 = vunpack.c.l.bf16 %v681_v1  ;;  %v2852_v4 = vld [vmem:[%s2660_s23 + $0x70] sm:$0xff]  ;;  %v2857_v5 = vld [vmem:[%s3511_s1 + $0xa8] sm:$0xff]  ;;  %v2870_v8 = vld [vmem:[%s3511_s1 + $0x98] sm:$0xff]  ;;  %v699_v21 = vunpack.c.h.bf16 %v681_v1 }
  0x51   : > { %v724_v6 = vunpack.c.l.bf16 %v2852_v4  ;;  %v682_v9 = vld [vmem:[%s2660_s23 + $0x10] sm:$0xff]  ;;  %v2881_v12 = vld [vmem:[%s2660_s23 + $0x78] sm:$0xff]  ;;  %v2886_v13 = vld [vmem:[%s3511_s1 + $0x88] sm:$0xff] }
  0x52   : > { %2168 = vmatpush.msra.mxu2 %v2709_v38  ;;  %734 = vmatpush.msra.mxu1 %v2709_v38  ;;  %v2877_v10 = vld [vmem:[%s3511_s1 + $0x90] sm:$0xff]  ;;  %v700_v11 = vunpack.c.l.bf16 %v682_v9  ;;  %v726_v14 = vunpack.c.l.bf16 %v2881_v12  ;;  %v2893_v15 = vld [vmem:[%s3511_s1 + $0x80] sm:$0xff]  ;;  %v683_v16 = vld [vmem:[%s2660_s23 + $0x18] sm:$0xff]  ;;  %v701_v24 = vunpack.c.h.bf16 %v682_v9 }
  0x53   : > { %v702_v17 = vunpack.c.l.bf16 %v683_v16  ;;  %v684_v19 = vld [vmem:[%s2660_s23 + $0x20] sm:$0xff]  ;;  %v685_v22 = vld [vmem:[%s2660_s23 + $0x28] sm:$0xff]  ;;  %v686_v25 = vld [vmem:[%s2660_s23 + $0x30] sm:$0xff]  ;;  %v703_v27 = vunpack.c.h.bf16 %v683_v16  ;;  %v719_v16 = vunpack.c.h.bf16 %v2762_v46 }
  0x54   : > { %2169 = vmatpush.msra.mxu2 %v2716_v39  ;;  %735 = vmatpush.msra.mxu1 %v2716_v39  ;;  %v704_v20 = vunpack.c.l.bf16 %v684_v19  ;;  %v706_v23 = vunpack.c.l.bf16 %v685_v22  ;;  %v708_v26 = vunpack.c.l.bf16 %v686_v25  ;;  %v687_v28 = vld [vmem:[%s2660_s23 + $0x38] sm:$0xff]  ;;  %v705_v30 = vunpack.c.h.bf16 %v684_v19  ;;  %v688_v31 = vld [vmem:[%s2660_s23 + $0x40] sm:$0xff]  ;;  %v689_v57 = vld [vmem:[%s2660_s23 + $0x48] sm:$0xff] }
  0x55   : > { %v710_v29 = vunpack.c.l.bf16 %v687_v28  ;;  %v690_v1 = vld [vmem:[%s2660_s23 + $0x50] sm:$0xff]  ;;  %v713_v9 = vunpack.c.h.bf16 %v688_v31  ;;  %v559_v46 = vld [vmem:[%s3514_s4 + $0x8] sm:$0xff] }
  0x56   : > { %2170 = vmatpush.msra.mxu2 %v2723_v40  ;;  %736 = vmatpush.msra.mxu1 %v2723_v40  ;;  %v560_v19 = vld [vmem:[%s3514_s4 + $0x10] sm:$0xff] }
  0x58   : > { %2171 = vmatpush.msra.mxu2 %v2730_v41  ;;  %737 = vmatpush.msra.mxu1 %v2730_v41 }
  0x5a   : > { %2172 = vmatpush.msra.mxu2 %v2737_v42  ;;  %738 = vmatpush.msra.mxu1 %v2737_v42 }
  0x5c   : > { %2173 = vmatpush.msra.mxu2 %v2744_v43  ;;  %739 = vmatpush.msra.mxu1 %v2744_v43 }
  0x5e   : > { %2174 = vmatpush.msra.mxu2 %v2751_v44  ;;  %740 = vmatpush.msra.mxu1 %v2751_v44 }
  0x60   : > { %2175 = vmatpush.msra.mxu2 %v2758_v45  ;;  %741 = vmatpush.msra.mxu1 %v2758_v45 }
  0x62   : > { %2176 = vmatpush.msra.mxu2 %v2768_v47  ;;  %742 = vmatpush.msra.mxu1 %v2768_v47 }
  0x64   : > { %2177 = vmatpush.msra.mxu2 %v2775_v48  ;;  %743 = vmatpush.msra.mxu1 %v2775_v48 }
  0x65   : > { %777 = vmatmul.f32.vlgmr.msra.gmra.mxu2 %v718_v49  ;;  %744 = vmatmul.f32.vlgmr.msra.gmra.mxu1 %v696_v59  ;;  %v712_v49 = vunpack.c.l.bf16 %v688_v31  ;;  %v714_v59 = vunpack.c.l.bf16 %v689_v57 }
  0x66   : > { %793 = vmatpush.msrb.mxu2 %v2783_v50 }
  0x68   : > { %794 = vmatpush.msrb.mxu2 %v2790_v51 }
  0x6a   : > { %795 = vmatpush.msrb.mxu2 %v2799_v53 }
  0x6c   : > { %796 = vmatpush.msrb.mxu2 %v2806_v55 }
  0x6d   : > { %780 = vmatmul.f32.gmra.mxu2 %v720_v54  ;;  %747 = vmatmul.f32.gmra.mxu1 %v698_v3  ;;  %v707_v54 = vunpack.c.h.bf16 %v685_v22  ;;  %v716_v3 = vunpack.c.l.bf16 %v690_v1 }
  0x6e   : > { %797 = vmatpush.msrb.mxu2 %v2812_v56 }
  0x70   : > { %798 = vmatpush.msrb.mxu2 %v2819_v58 }
  0x72   : > { %799 = vmatpush.msrb.mxu2 %v2828_v61 }
  0x74   : > { %800 = vmatpush.msrb.mxu2 %v2835_v63 }
  0x75   : > { %783 = vmatmul.f32.gmra.mxu2 %v722_v62  ;;  %750 = vmatmul.f32.gmra.mxu1 %v700_v11  ;;  %v709_v62 = vunpack.c.h.bf16 %v686_v25  ;;  %v715_v11 = vunpack.c.h.bf16 %v689_v57  ;;  %v554_v25 = vld [vmem:[%s3513_s3] sm:$0xff] }
  0x76   : > { %801 = vmatpush.msrb.mxu2 %v2841_v0 }
  0x78   : > { %802 = vmatpush.msrb.mxu2 %v2848_v2 }
  0x7a   : > { %803 = vmatpush.msrb.mxu2 %v2857_v5 }
  0x7c   : > { %804 = vmatpush.msrb.mxu2 %v2864_v7 }
  0x7d   : > { %786 = vmatmul.f32.gmra.mxu2 %v724_v6  ;;  %753 = vmatmul.f32.gmra.mxu1 %v702_v17  ;;  %v711_v6 = vunpack.c.h.bf16 %v687_v28 }
  0x7e   : > { %805 = vmatpush.msrb.mxu2 %v2870_v8 }
  0x80   : > { %806 = vmatpush.msrb.mxu2 %v2877_v10 }
  0x82   : > { %807 = vmatpush.msrb.mxu2 %v2886_v13 }
  0x84   : > { %808 = vmatpush.msrb.mxu2 %v2893_v15 }
  0x85   : > { %789 = vmatmul.f32.gmra.mxu2 %v726_v14  ;;  %756 = vmatmul.f32.gmra.mxu1 %v704_v20  ;;  %v717_v14 = vunpack.c.h.bf16 %v690_v1  ;;  %v557_v20 = vld [vmem:[%s3513_s3 + $0x18] sm:$0xff]  ;;  %v518_v1 = vld [vmem:[%s2934_s26 + $0x60] sm:$0xff] }
  0x86   : > { %627 = vmatpush.msra.mxu0 %v557_v20 }
  0x8d   : > { %809 = vmatmul.f32.vlgmr.msrb.gmra.mxu2 %v697_v18  ;;  %759 = vmatmul.f32.gmra.mxu1 %v706_v23  ;;  %v561_v18 = vld [vmem:[%s3514_s4 + $0x18] sm:$0xff]  ;;  %v723_v23 = vunpack.c.h.bf16 %v2823_v60  ;;  %v555_v60 = vld [vmem:[%s3513_s3 + $0x8] sm:$0xff] }
  0x8e   : > { %918 = vmatpush.msra.mxu3 %v561_v18  ;;  %1226 = vmatpush.msrb.mxu1 %v561_v18 }
  0x90   : > { %919 = vmatpush.msra.mxu3 %v560_v19  ;;  %1227 = vmatpush.msrb.mxu1 %v560_v19  ;;  %v1308_v19 = vld [vmem:[#allocation3 + $0x60] sm:$0xff] }
  0x92   : > { %920 = vmatpush.msra.mxu3 %v559_v46  ;;  %1228 = vmatpush.msrb.mxu1 %v559_v46  ;;  %v1307_v46 = vld [vmem:[#allocation3 + $0x58] sm:$0xff] }
  0x95   : > { %812 = vmatmul.f32.gmra.mxu2 %v699_v21  ;;  %762 = vmatmul.f32.gmra.mxu1 %v708_v26  ;;  %v721_v21 = vunpack.c.h.bf16 %v2794_v52  ;;  %v556_v52 = vld [vmem:[%s3513_s3 + $0x10] sm:$0xff]  ;;  %v506_v26 = vld [vmem:[%s2934_s26] sm:$0xff] }
  0x96   : > { %628 = vmatpush.msra.mxu0 %v556_v52  ;;  %v1305_v52 = vld [vmem:[#allocation3 + $0x48] sm:$0xff] }
  0x98   : > { %629 = vmatpush.msra.mxu0 %v555_v60  ;;  %v1304_v60 = vld [vmem:[#allocation3 + $0x40] sm:$0xff] }
  0x9a   : > { %630 = vmatpush.msra.mxu0 %v554_v25 }
  0x9b   : > { %2089 = vmatmul.msk.f32.vlgmr.msra.gmra.mxu0 %vm566_vm0, %v506_v26 }
  0x9c   : > { %1036 = vmatpush.msrb.mxu0 %v2669_v32 }
  0x9d   : > { %815 = vmatmul.f32.gmra.mxu2 %v701_v24  ;;  %765 = vmatmul.f32.gmra.mxu1 %v710_v29  ;;  %v558_v24 = vld [vmem:[%s3514_s4] sm:$0xff]  ;;  %v516_v29 = vld [vmem:[%s2934_s26 + $0x50] sm:$0xff] }
  0x9e   : > { %921 = vmatpush.msra.mxu3 %v558_v24  ;;  %1229 = vmatpush.msrb.mxu1 %v558_v24  ;;  %v520_v24 = vld [vmem:[%s2934_s26 + $0x70] sm:$0xff] }
  0x9f   : > { %1037 = vmatpush.msrb.mxu0 %v2674_v33  ;;  %v727_v33 = vunpack.c.h.bf16 %v2881_v12 }
  0xa0   : > { %1101 = vmatpush.msrb.mxu3 %v2783_v50 }
  0xa1   : > { %1038 = vmatpush.msrb.mxu0 %v2681_v34 }
  0xa2   : > { %1102 = vmatpush.msrb.mxu3 %v2790_v51  ;;  %v507_v51 = vld [vmem:[%s2934_s26 + $0x8] sm:$0xff] }
  0xa3   : > { %1039 = vmatpush.msrb.mxu0 %v2688_v35 }
  0xa4   : > { %1103 = vmatpush.msrb.mxu3 %v2799_v53  ;;  %2090 = vmatmul.msk.f32.gmra.mxu0 %vm566_vm0, %v507_v51  ;;  %v508_v53 = vld [vmem:[%s2934_s26 + $0x10] sm:$0xff]  ;;  %v1301_v51 = vld [vmem:[#allocation3 + $0x28] sm:$0xff] }
  0xa5   : > { %818 = vmatmul.f32.gmra.mxu2 %v703_v27  ;;  %768 = vmatmul.f32.gmra.mxu1 %v712_v49  ;;  %v725_v27 = vunpack.c.h.bf16 %v2852_v4  ;;  %v514_v4 = vld [vmem:[%s2934_s26 + $0x40] sm:$0xff] }
  0xa6   : > { %1104 = vmatpush.msrb.mxu3 %v2806_v55  ;;  %1040 = vmatpush.msrb.mxu0 %v2695_v36  ;;  %v509_v36 = vld [vmem:[%s2934_s26 + $0x18] sm:$0xff] }
  0xa8   : > { %1105 = vmatpush.msrb.mxu3 %v2812_v56  ;;  %1041 = vmatpush.msrb.mxu0 %v2702_v37 }
  0xaa   : > { %1106 = vmatpush.msrb.mxu3 %v2819_v58  ;;  %1042 = vmatpush.msrb.mxu0 %v2709_v38 }
  0xac   : > { %1107 = vmatpush.msrb.mxu3 %v2828_v61  ;;  %1043 = vmatpush.msrb.mxu0 %v2716_v39 }
  0xad   : > { %821 = vmatmul.f32.gmra.mxu2 %v705_v30  ;;  %771 = vmatmul.f32.gmra.mxu1 %v714_v59 }
  0xae   : > { %1108 = vmatpush.msrb.mxu3 %v2835_v63  ;;  %2091 = vmatmul.msk.f32.gmra.mxu0 %vm566_vm0, %v508_v53  ;;  %v513_v63 = vld [vmem:[%s2934_s26 + $0x38] sm:$0xff] }
  0xaf   : > { %1044 = vmatpush.msrb.mxu0 %v2723_v40  ;;  %v510_v40 = vld [vmem:[%s2934_s26 + $0x20] sm:$0xff]  ;;  %v1299_v53 = vld [vmem:[#allocation3 + $0x18] sm:$0xff] }
  0xb0   : > { %1109 = vmatpush.msrb.mxu3 %v2841_v0 }
  0xb1   : > { %1045 = vmatpush.msrb.mxu0 %v2730_v41 }
  0xb2   : > { %1110 = vmatpush.msrb.mxu3 %v2848_v2 }
  0xb3   : > { %1046 = vmatpush.msrb.mxu0 %v2737_v42 }
  0xb4   : > { %1111 = vmatpush.msrb.mxu3 %v2857_v5 }
  0xb5   : > { %824 = vmatmul.f32.gmra.mxu2 %v707_v54  ;;  %774 = vmatmul.f32.gmra.mxu1 %v716_v3  ;;  %v517_v54 = vld [vmem:[%s2934_s26 + $0x58] sm:$0xff] }
  0xb6   : > { %1112 = vmatpush.msrb.mxu3 %v2864_v7  ;;  %1047 = vmatpush.msrb.mxu0 %v2744_v43 }
  0xb7   : > { %2092 = vmatmul.msk.f32.gmra.mxu0 %vm566_vm0, %v509_v36 }
  0xb8   : > { %1113 = vmatpush.msrb.mxu3 %v2870_v8  ;;  %1048 = vmatpush.msrb.mxu0 %v2751_v44  ;;  %v511_v44 = vld [vmem:[%s2934_s26 + $0x28] sm:$0xff] }
  0xba   : > { %1114 = vmatpush.msrb.mxu3 %v2877_v10  ;;  %1049 = vmatpush.msrb.mxu0 %v2758_v45  ;;  %v515_v10 = vld [vmem:[%s2934_s26 + $0x48] sm:$0xff] }
  0xbc   : > { %1115 = vmatpush.msrb.mxu3 %v2886_v13  ;;  %1050 = vmatpush.msrb.mxu0 %v2768_v47  ;;  %v512_v47 = vld [vmem:[%s2934_s26 + $0x30] sm:$0xff] }
  0xbd   : > { %827 = vmatmul.f32.gmra.mxu2 %v709_v62 }
  0xbe   : > { %1116 = vmatpush.msrb.mxu3 %v2893_v15  ;;  %1051 = vmatpush.msrb.mxu0 %v2775_v48 }
  0xbf   : > { %2093 = vmatmul.msk.f32.gmra.mxu0 %vm566_vm0, %v510_v40  ;;  %v2121_v40 = vld [vmem:[%s2660_s23 + $0x80] sm:$0xff] }
  0xc5   : > { %830 = vmatmul.f32.gmra.mxu2 %v711_v6 }
  0xc7   : > { %2094 = vmatmul.msk.f32.gmra.mxu0 %vm566_vm0, %v511_v44 }
  0xcd   : > { %833 = vmatmul.f32.gmra.mxu2 %v713_v9  ;;  %v1311_v9 = vld [vmem:[#allocation3 + $0x78] sm:$0xff] }
  0xce   : > { %1312 = vmatpush.msra.mxu2 %v1311_v9 }
  0xcf   : > { %2095 = vmatmul.msk.f32.gmra.mxu0 %vm566_vm0, %v512_v47 }
  0xd5   : > { %836 = vmatmul.f32.gmra.mxu2 %v715_v11  ;;  %v1310_v11 = vld [vmem:[#allocation3 + $0x70] sm:$0xff] }
  0xd6   : > { %1313 = vmatpush.msra.mxu2 %v1310_v11 }
  0xd7   : > { %2096 = vmatmul.msk.f32.gmra.mxu0 %vm566_vm0, %v513_v63 }
  0xdd   : > { %839 = vmatmul.f32.gmra.mxu2 %v717_v14  ;;  %v1309_v14 = vld [vmem:[#allocation3 + $0x68] sm:$0xff] }
  0xde   : > { %1314 = vmatpush.msra.mxu2 %v1309_v14 }
  0xdf   : > { %2097 = vmatmul.msk.f32.gmra.mxu0 %vm566_vm0, %v514_v4  ;;  %v1005_v4 = vunpack.c.h.bf16 %v2121_v40 }
  0xe0   : > { %1315 = vmatpush.msra.mxu2 %v1308_v19 }
  0xe2   : > { %v745_v28 = vpop.f32.mrf.mxu1  ;;  %1316 = vmatpush.msra.mxu2 %v1307_v46 }
  0xe5   : > { %842 = vmatmul.f32.gmra.mxu2 %v719_v16  ;;  %v519_v16 = vld [vmem:[%s2934_s26 + $0x68] sm:$0xff] }
  0xe7   : > { %2098 = vmatmul.msk.f32.gmra.mxu0 %vm566_vm0, %v515_v10  ;;  %v2125_v10 = vld [vmem:[%s2660_s23 + $0xa0] sm:$0xff] }
  0xe8   : > { %v2907_v17 = vpop.f32.mrf.mxu2  ;;  %v1013_v46 = vunpack.c.h.bf16 %v2125_v10 }
  0xea   : > { %v748_v34 = vpop.f32.mrf.mxu1 }
  0xed   : > { %845 = vmatmul.f32.gmra.mxu2 %v721_v21 }
  0xef   : > { %2099 = vmatmul.msk.f32.gmra.mxu0 %vm566_vm0, %v516_v29 }
  0xf0   : > { %v2922_v22 = vpop.f32.mrf.mxu2 }
  0xf2   : > { %v751_v37 = vpop.f32.mrf.mxu1 }
  0xf5   : > { %848 = vmatmul.f32.gmra.mxu2 %v723_v23  ;;  %v1306_v23 = vld [vmem:[#allocation3 + $0x50] sm:$0xff] }
  0xf6   : > { %1317 = vmatpush.msra.mxu2 %v1306_v23 }
  0xf7   : > { %2100 = vmatmul.msk.f32.gmra.mxu0 %vm566_vm0, %v517_v54 }
  0xf8   : > { %v2947_v50 = vpop.f32.mrf.mxu2  ;;  %1318 = vmatpush.msra.mxu2 %v1305_v52 }
  0xfa   : > { %v754_v42 = vpop.f32.mrf.mxu1  ;;  %1319 = vmatpush.msra.mxu2 %v1304_v60 }
  0xfd   : > { %851 = vmatmul.f32.gmra.mxu2 %v725_v27  ;;  %v1303_v27 = vld [vmem:[#allocation3 + $0x38] sm:$0xff] }
  0xfe   : > { %1320 = vmatpush.msra.mxu2 %v1303_v27 }
  0xff   : > { %2101 = vmatmul.msk.f32.gmra.mxu0 %vm566_vm0, %v518_v1 }
 0x100   : > { %v2960_v32 = vpop.f32.mrf.mxu2 }
 0x102   : > { %v757_v56 = vpop.f32.mrf.mxu1 }
 0x105   : > { %854 = vmatmul.f32.gmra.mxu2 %v727_v33  ;;  %v521_v33 = vld [vmem:[%s2934_s26 + $0x78] sm:$0xff]  ;;  %s3396_s26 = scalar_lea.vmem [#allocation6], %s2086_s15  ;;  %s2413_s15 = scalar_lea.hbm %s3518_s8, 256 }
 0x106   : > { %s1980_s12 = sshll.u32 %s3396_s26, 4  ;;  %s1981_s12 = int_to_ptr.vmem [resolvable:$true] %s1980_s12 }
 0x107   : > { %2102 = vmatmul.msk.f32.gmra.mxu0 %vm566_vm0, %v519_v16 }
 0x108   : > { %v2973_v35 = vpop.f32.mrf.mxu2 }
 0x10a   : > { %v760_v61 = vpop.f32.mrf.mxu1 }
 0x10f   : > { %2103 = vmatmul.msk.f32.gmra.mxu0 %vm566_vm0, %v520_v24 }
 0x110   : > { %v810_v38 = vpop.f32.mrf.mxu2 }
 0x111   : > { %v811_v39 = vadd.f32 %v810_v38, %v745_v28  ;;  %v1302_v28 = vld [vmem:[#allocation3 + $0x30] sm:$0xff] }
 0x112   : > { %v763_v5 = vpop.f32.mrf.mxu1  ;;  %1321 = vmatpush.msra.mxu2 %v1302_v28 }
 0x113   : > { %2105 = vmatmul.msk.f32.vlgmr.msra.gmra.mxu3 %vm566_vm0, %v811_v39  ;;  %v1297_v39 = vld [vmem:[#allocation3 + $0x8] sm:$0xff] }
 0x114   : > { %1322 = vmatpush.msra.mxu2 %v1301_v51 }
 0x117   : > { %2104 = vmatmul.msk.f32.gmra.mxu0 %vm566_vm0, %v521_v33 }
 0x118   : > { %v813_v41 = vpop.f32.mrf.mxu2  ;;  %v632_v38 = vpop.f32.mrf.mxu0 }
 0x119   : > { %v814_v43 = vadd.f32 %v813_v41, %v748_v34  ;;  %v1300_v34 = vld [vmem:[#allocation3 + $0x20] sm:$0xff] }
 0x11a   : > { %v766_v13 = vpop.f32.mrf.mxu1  ;;  %1323 = vmatpush.msra.mxu2 %v1300_v34  ;;  %v1296_v41 = vld [vmem:[#allocation3] sm:$0xff] }
 0x11b   : > { %2106 = vmatmul.msk.f32.gmra.mxu3 %vm566_vm0, %v814_v43 }
 0x11c   : > { %1324 = vmatpush.msra.mxu2 %v1299_v53  ;;  %v2130_v53 = vld [vmem:[%s2660_s23 + $0xc8] sm:$0xff] }
 0x120   : > { %v816_v45 = vpop.f32.mrf.mxu2 }
 0x121   : > { %v817_v55 = vadd.f32 %v816_v45, %v751_v37  ;;  %v2122_v45 = vld [vmem:[%s2660_s23 + $0x88] sm:$0xff] }
 0x122   : > { %v769_v49 = vpop.f32.mrf.mxu1 }
 0x123   : > { %2107 = vmatmul.msk.f32.gmra.mxu3 %vm566_vm0, %v817_v55  ;;  %v1006_v55 = vunpack.c.l.bf16 %v2122_v45 }
 0x128   : > { %v819_v48 = vpop.f32.mrf.mxu2 }
 0x129   : > { %v820_v58 = vadd.f32 %v819_v48, %v754_v42  ;;  %v1004_v42 = vunpack.c.l.bf16 %v2121_v40 }
 0x12a   : > { %v772_v62 = vpop.f32.mrf.mxu1 }
 0x12b   : > { %2108 = vmatmul.msk.f32.gmra.mxu3 %vm566_vm0, %v820_v58  ;;  %1052 = vmatmul.f32.vlgmr.msrb.gmra.mxu0 %v1004_v42  ;;  %v2123_v58 = vld [vmem:[%s2660_s23 + $0x90] sm:$0xff] }
 0x130   : > { %v822_v0 = vpop.f32.mrf.mxu2 }
 0x131   : > { %v823_v2 = vadd.f32 %v822_v0, %v757_v56 }
 0x132   : > { %v775_v18 = vpop.f32.mrf.mxu1 }
 0x133   : > { %2109 = vmatmul.msk.f32.gmra.mxu3 %vm566_vm0, %v823_v2  ;;  %1055 = vmatmul.f32.gmra.mxu0 %v1006_v55  ;;  %v2124_v2 = vld [vmem:[%s2660_s23 + $0x98] sm:$0xff] }
 0x134   : > { %v1011_v11 = vunpack.c.h.bf16 %v2124_v2 }
 0x138   : > { %v825_v7 = vpop.f32.mrf.mxu2 }
 0x139   : > { %v826_v8 = vadd.f32 %v825_v7, %v760_v61  ;;  %v1008_v61 = vunpack.c.l.bf16 %v2123_v58 }
 0x13b   : > { %2110 = vmatmul.msk.f32.gmra.mxu3 %vm566_vm0, %v826_v8  ;;  %1058 = vmatmul.f32.gmra.mxu0 %v1008_v61 }
 0x140   : > { %v828_v12 = vpop.f32.mrf.mxu2 }
 0x141   : > { %v829_v15 = vadd.f32 %v828_v12, %v763_v5  ;;  %v1010_v5 = vunpack.c.l.bf16 %v2124_v2 }
 0x143   : > { %2111 = vmatmul.msk.f32.gmra.mxu3 %vm566_vm0, %v829_v15  ;;  %1061 = vmatmul.f32.gmra.mxu0 %v1010_v5  ;;  %v1012_v15 = vunpack.c.l.bf16 %v2125_v10 }
 0x148   : > { %v831_v30 = vpop.f32.mrf.mxu2 }
 0x149   : > { %v832_v31 = vadd.f32 %v831_v30, %v766_v13  ;;  %v1007_v13 = vunpack.c.h.bf16 %v2122_v45 }
 0x14b   : > { %2112 = vmatmul.msk.f32.gmra.mxu3 %vm566_vm0, %v832_v31  ;;  %1064 = vmatmul.f32.gmra.mxu0 %v1012_v15 }
 0x150   : > { %v834_v57 = vpop.f32.mrf.mxu2 }
 0x151   : > { %v835_v59 = vadd.f32 %v834_v57, %v769_v49  ;;  %v2126_v49 = vld [vmem:[%s2660_s23 + $0xa8] sm:$0xff]  ;;  %v1009_v57 = vunpack.c.h.bf16 %v2123_v58 }
 0x152   : > { %v1015_v27 = vunpack.c.h.bf16 %v2126_v49 }
 0x153   : > { %2113 = vmatmul.msk.f32.gmra.mxu3 %vm566_vm0, %v835_v59  ;;  %v1014_v59 = vunpack.c.l.bf16 %v2126_v49  ;;  %v3141_v49 = vld [vmem:[#allocation3 + $0xd0] sm:$0xff] }
 0x155   : > { %1067 = vmatmul.f32.gmra.mxu0 %v1014_v59  ;;  %v2134_v59 = vld [vmem:[%s2660_s23 + $0xe8] sm:$0xff] }
 0x158   : > { %v837_v3 = vpop.f32.mrf.mxu2 }
 0x159   : > { %v838_v6 = vadd.f32 %v837_v3, %v772_v62 }
 0x15b   : > { %2114 = vmatmul.msk.f32.gmra.mxu3 %vm566_vm0, %v838_v6  ;;  %v2127_v6 = vld [vmem:[%s2660_s23 + $0xb0] sm:$0xff] }
 0x15c   : > { %v1016_v14 = vunpack.c.l.bf16 %v2127_v6 }
 0x15e   : > { %1070 = vmatmul.f32.gmra.mxu0 %v1016_v14  ;;  %v3152_v14 = vld [vmem:[#allocation3 + $0xc0] sm:$0xff] }
 0x160   : > { %v840_v20 = vpop.f32.mrf.mxu2 }
 0x161   : > { %v841_v21 = vadd.f32 %v840_v20, %v775_v18  ;;  %v2128_v20 = vld [vmem:[%s2660_s23 + $0xb8] sm:$0xff] }
 0x162   : > { %v1018_v23 = vunpack.c.l.bf16 %v2128_v20 }
 0x163   : > { %2115 = vmatmul.msk.f32.gmra.mxu3 %vm566_vm0, %v841_v21 }
 0x166   : > { %1073 = vmatmul.f32.gmra.mxu0 %v1018_v23 }
 0x168   : > { %v843_v25 = vpop.f32.mrf.mxu2 }
 0x169   : > { %v844_v26 = vadd.f32 %v843_v25, %v2907_v17  ;;  %v1298_v17 = vld [vmem:[#allocation3 + $0x10] sm:$0xff]  ;;  %v2129_v25 = vld [vmem:[%s2660_s23 + $0xc0] sm:$0xff] }
 0x16a   : > { %1325 = vmatpush.msra.mxu2 %v1298_v17  ;;  %v1020_v28 = vunpack.c.l.bf16 %v2129_v25  ;;  %v1022_v17 = vunpack.c.l.bf16 %v2130_v53 }
 0x16b   : > { %2116 = vmatmul.msk.f32.gmra.mxu3 %vm566_vm0, %v844_v26 }
 0x16c   : > { %1326 = vmatpush.msra.mxu2 %v1297_v39 }
 0x16e   : > { %1327 = vmatpush.msra.mxu2 %v1296_v41  ;;  %1076 = vmatmul.f32.gmra.mxu0 %v1020_v28  ;;  %v2131_v41 = vld [vmem:[%s2660_s23 + $0xd0] sm:$0xff] }
 0x170   : > { %v846_v36 = vpop.f32.mrf.mxu2 }
 0x171   : > { %v847_v37 = vadd.f32 %v846_v36, %v2922_v22  ;;  %v635_v22 = vpop.f32.mrf.mxu0 }
 0x173   : > { %2117 = vmatmul.msk.f32.gmra.mxu3 %vm566_vm0, %v847_v37  ;;  %v1017_v37 = vunpack.c.h.bf16 %v2127_v6  ;;  %v3148_v6 = vld [vmem:[#allocation3 + $0xc8] sm:$0xff] }
 0x176   : > { %1079 = vmatmul.f32.gmra.mxu0 %v1022_v17 }
 0x178   : > { %v849_v43 = vpop.f32.mrf.mxu2 }
 0x179   : > { %v850_v44 = vadd.f32 %v849_v43, %v2947_v50  ;;  %v638_v48 = vpop.f32.mrf.mxu0  ;;  %v1019_v43 = vunpack.c.h.bf16 %v2128_v20 }
 0x17b   : > { %2118 = vmatmul.msk.f32.gmra.mxu3 %vm566_vm0, %v850_v44  ;;  %v1024_v44 = vunpack.c.l.bf16 %v2131_v41 }
 0x17e   : > { %1082 = vmatmul.f32.gmra.mxu0 %v1024_v44  ;;  %v3190_v44 = vld [vmem:[#allocation3 + $0x88] sm:$0xff] }
 0x180   : > { %v852_v56 = vpop.f32.mrf.mxu2 }
 0x181   : > { %v853_v47 = vadd.f32 %v852_v56, %v2960_v32  ;;  %v641_v0 = vpop.f32.mrf.mxu0  ;;  %v3042_v32 = vld [vmem:[%s3515_s5] ss:$0 sm:$0xff]  ;;  %v2132_v56 = vld [vmem:[%s2660_s23 + $0xd8] sm:$0xff] }
 0x182   : > { %v3045_v7 = vadd.f32 %v3042_v32, %v632_v38  ;;  %v3053_v29 = vadd.f32 %v3042_v32, %v635_v22  ;;  %v3061_v62 = vadd.f32 %v3042_v32, %v638_v48  ;;  %v3069_v16 = vadd.f32 %v3042_v32, %v641_v0  ;;  %v3118_v0 = vld [vmem:[#allocation3 + $0xf0] sm:$0xff] }
 0x183   : > { %2119 = vmatmul.msk.f32.gmra.mxu3 %vm566_vm0, %v853_v47  ;;  %v1021_v48 = vunpack.c.h.bf16 %v2129_v25  ;;  %v1026_v58 = vunpack.c.l.bf16 %v2132_v56  ;;  %v1027_v25 = vunpack.c.h.bf16 %v2132_v56 }
 0x186   : > { %1085 = vmatmul.f32.gmra.mxu0 %v1026_v58 }
 0x188   : > { %v855_v63 = vpop.f32.mrf.mxu2 }
 0x189   : > { %v856_v50 = vadd.f32 %v855_v63, %v2973_v35  ;;  %v644_v8 = vpop.f32.mrf.mxu0  ;;  %v3113_v63 = vld [vmem:[#allocation3 + $0xf8] sm:$0xff] }
 0x18a   : > { %v3077_v52 = vadd.f32 %v3042_v32, %v644_v8  ;;  %2194 = vmatpush.msra.mxu3 %v3113_v63  ;;  %v1023_v8 = vunpack.c.h.bf16 %v2130_v53  ;;  %v3179_v53 = vld [vmem:[#allocation3 + $0x98] sm:$0xff] }
 0x18b   : > { %2120 = vmatmul.msk.f32.gmra.mxu3 %vm566_vm0, %v856_v50 }
 0x18c   : > { %2195 = vmatpush.msra.mxu3 %v3118_v0 }
 0x191   : > { %v647_v30 = vpop.f32.mrf.mxu0 }
 0x192   : > { %v3085_v51 = vadd.f32 %v3042_v32, %v647_v30  ;;  %v3138_v30 = vld [vmem:[#allocation3 + $0xd8] sm:$0xff] }
 0x193   : > { %1117 = vmatmul.f32.vlgmr.msrb.gmra.mxu3 %v1005_v4  ;;  %v3121_v4 = vld [vmem:[%s2660_s23 + $0xe0] sm:$0xff] }
 0x194   : > { %v1028_v10 = vunpack.c.l.bf16 %v3121_v4 }
 0x196   : > { %v923_v35 = vpop.f32.mrf.mxu3  ;;  %1088 = vmatmul.f32.gmra.mxu0 %v1028_v10 }
 0x197   : > { %v3049_v12 = vadd.f32 %v923_v35, %v3045_v7  ;;  %v3127_v35 = vld [vmem:[#allocation3 + $0xe8] sm:$0xff] }
 0x198   : > { %2196 = vmatpush.msra.mxu3 %v3127_v35 }
 0x199   : > { %3527 = vst [vmem:[#allocation9_spill] sm:$0xff] %v3049_v12  ;;  %1328 = vmatmul.f32.vlgmr.msra.gmra.mxu2 %v3049_v12  ;;  %v650_v1 = vpop.f32.mrf.mxu0 }
 0x19a   : > { %v3093_v38 = vadd.f32 %v3042_v32, %v650_v1 }
 0x19b   : > { %1120 = vmatmul.f32.gmra.mxu3 %v1007_v13  ;;  %v3132_v13 = vld [vmem:[#allocation3 + $0xe0] sm:$0xff] }
 0x19c   : > { %2197 = vmatpush.msra.mxu3 %v3132_v13 }
 0x19e   : > { %v926_v31 = vpop.f32.mrf.mxu3  ;;  %2198 = vmatpush.msra.mxu3 %v3138_v30 }
 0x19f   : > { %v3057_v54 = vadd.f32 %v926_v31, %v3053_v29 }
 0x1a0   : > { %2199 = vmatpush.msra.mxu3 %v3141_v49 }
 0x1a1   : > { %3528 = vst [vmem:[#allocation10_spill] sm:$0xff] %v3057_v54  ;;  %1331 = vmatmul.f32.gmra.mxu2 %v3057_v54  ;;  %v653_v18 = vpop.f32.mrf.mxu0 }
 0x1a2   : > { %v3101_v22 = vadd.f32 %v3042_v32, %v653_v18  ;;  %2200 = vmatpush.msra.mxu3 %v3148_v6 }
 0x1a3   : > { %1123 = vmatmul.f32.gmra.mxu3 %v1009_v57 }
 0x1a4   : > { %2201 = vmatpush.msra.mxu3 %v3152_v14 }
 0x1a6   : > { %v929_v3 = vpop.f32.mrf.mxu3 }
 0x1a7   : > { %v3065_v9 = vadd.f32 %v929_v3, %v3061_v62  ;;  %v1025_v3 = vunpack.c.h.bf16 %v2131_v41 }
 0x1a9   : > { %1334 = vmatmul.f32.gmra.mxu2 %v3065_v9  ;;  %v656_v24 = vpop.f32.mrf.mxu0 }
 0x1aa   : > { %v3111_v61 = vadd.f32 %v3042_v32, %v656_v24  ;;  %v2135_v24 = vld [vmem:[%s2660_s23 + $0xf0] sm:$0xff] }
 0x1ab   : > { %1126 = vmatmul.f32.gmra.mxu3 %v1011_v11  ;;  %v1030_v11 = vunpack.c.l.bf16 %v2134_v59  ;;  %v1032_v28 = vunpack.c.l.bf16 %v2135_v24 }
 0x1ad   : > { %1091 = vmatmul.f32.gmra.mxu0 %v1030_v11 }
 0x1ae   : > { %v932_v19 = vpop.f32.mrf.mxu3 }
 0x1af   : > { %v3073_v21 = vadd.f32 %v932_v19, %v3069_v16  ;;  %v3158_v19 = vld [vmem:[#allocation3 + $0xb8] sm:$0xff] }
 0x1b0   : > { %2202 = vmatpush.msra.mxu3 %v3158_v19 }
 0x1b1   : > { %1337 = vmatmul.f32.gmra.mxu2 %v3073_v21  ;;  %v659_v33 = vpop.f32.mrf.mxu0 }
 0x1b2   : > { %v3136_v15 = vadd.f32 %v3042_v32, %v659_v33  ;;  %v3172_v33 = vld [vmem:[#allocation3 + $0xa0] sm:$0xff] }
 0x1b3   : > { %1129 = vmatmul.f32.gmra.mxu3 %v1013_v46  ;;  %v3161_v46 = vld [vmem:[#allocation3 + $0xb0] sm:$0xff] }
 0x1b4   : > { %2203 = vmatpush.msra.mxu3 %v3161_v46 }
 0x1b5   : > { %1094 = vmatmul.f32.gmra.mxu0 %v1032_v28 }
 0x1b6   : > { %v935_v60 = vpop.f32.mrf.mxu3 }
 0x1b7   : > { %v3081_v26 = vadd.f32 %v935_v60, %v3077_v52 }
 0x1b9   : > { %1340 = vmatmul.f32.gmra.mxu2 %v3081_v26  ;;  %v662_v39 = vpop.f32.mrf.mxu0 }
 0x1ba   : > { %v3156_v18 = vadd.f32 %v3042_v32, %v662_v39  ;;  %v2136_v39 = vld [vmem:[%s2660_s23 + $0xf8] sm:$0xff]  ;;  %s2407_s23 = sshra.s32 %s1983_s22, 4  ;;  %s2408_s23 = int_to_ptr.hbm [resolvable:$true] %s2407_s23 }
 0x1bb   : > { %1132 = vmatmul.f32.gmra.mxu3 %v1015_v27  ;;  %v3168_v27 = vld [vmem:[#allocation3 + $0xa8] sm:$0xff]  ;;  %s2409_s24 = scalar_lea.hbm %s2408_s23, 128  ;;  %p2414_p7 = scmp.lt.s32.totalorder %s2408_s23, %s3518_s8 }
 0x1bc   : > { %2204 = vmatpush.msra.mxu3 %v3168_v27  ;;  %p2410_p3 = scmp.ne.s32.totalorder %s2408_s23, %s2409_s24  ;;  %p2415_p8 = scmp.lt.s32.totalorder %s2413_s15, %s2409_s24 }
 0x1be   : > { %v938_v34 = vpop.f32.mrf.mxu3  ;;  %2205 = vmatpush.msra.mxu3 %v3172_v33  ;;  %p2411_p4 = pnand %p2410_p3, %p2554_p6  ;;  %p2416_p9 = por %p2415_p8, %p2414_p7 }
 0x1bf   : > { %v3089_v36 = vadd.f32 %v938_v34, %v3085_v51 }
 0x1c0   : > { %2206 = vmatpush.msra.mxu3 %v3179_v53  ;;  %p2412_p5 = pneg %p2411_p4 }
 0x1c1   : > { %1343 = vmatmul.f32.gmra.mxu2 %v3089_v36  ;;  %v3103_v45 = vpop.f32.mrf.mxu0 }
 0x1c2   : > { %v3177_v34 = vadd.f32 %v3042_v32, %v3103_v45  ;;  %v1034_v45 = vunpack.c.l.bf16 %v2136_v39  ;;  %p2417_p11 = pnand %p2416_p9, %p2412_p5 }
 0x1c3   : > { %1135 = vmatmul.f32.gmra.mxu3 %v1017_v37  ;;  %v3182_v37 = vld [vmem:[#allocation3 + $0x90] sm:$0xff] }
 0x1c4   : > { %2207 = vmatpush.msra.mxu3 %v3182_v37  ;;  %1097 = vmatmul.f32.gmra.mxu0 %v1034_v45 }
 0x1c6   : > { %v941_v40 = vpop.f32.mrf.mxu3  ;;  %2208 = vmatpush.msra.mxu3 %v3190_v44 }
 0x1c7   : > { %v3097_v42 = vadd.f32 %v941_v40, %v3093_v38 }
 0x1c9   : > { %1346 = vmatmul.f32.gmra.mxu2 %v3097_v42  ;;  %v3115_v50 = vpop.f32.mrf.mxu0 }
 0x1ca   : > { %v3199_v56 = vadd.f32 %v3042_v32, %v3115_v50 }
 0x1cb   : > { %1138 = vmatmul.f32.gmra.mxu3 %v1019_v43  ;;  %v1029_v43 = vunpack.c.h.bf16 %v3121_v4  ;;  %v1031_v4 = vunpack.c.h.bf16 %v2134_v59 }
 0x1ce   : > { %v944_v55 = vpop.f32.mrf.mxu3 }
 0x1cf   : > { %v3107_v47 = vadd.f32 %v944_v55, %v3101_v22  ;;  %v3194_v55 = vld [vmem:[#allocation3 + $0x80] sm:$0xff] }
 0x1d0   : > { %2209 = vmatpush.msra.mxu3 %v3194_v55 }
 0x1d1   : > { %1349 = vmatmul.f32.gmra.mxu2 %v3107_v47  ;;  %v671_v31 = vpop.f32.mrf.mxu0 }
 0x1d3   : > { %1141 = vmatmul.f32.gmra.mxu3 %v1021_v48 }
 0x1d6   : > { %v947_v2 = vpop.f32.mrf.mxu3 }
 0x1d7   : > { %v3125_v5 = vadd.f32 %v947_v2, %v3111_v61 }
 0x1d9   : > { %1352 = vmatmul.f32.gmra.mxu2 %v3125_v5  ;;  %v674_v20 = vpop.f32.mrf.mxu0 }
 0x1da   : > { %v3213_v50 = vadd.f32 %v3042_v32, %v674_v20  ;;  %v1613_v20 = vld [vmem:[#allocation3 + $0x1f8] sm:$0xff] }
 0x1db   : > { %1144 = vmatmul.f32.gmra.mxu3 %v1023_v8  ;;  %v3206_v8 = vadd.f32 %v3042_v32, %v671_v31  ;;  %1614 = vmatpush.msra.mxu1 %v1613_v20  ;;  %v1610_v20 = vld [vmem:[#allocation3 + $0x1e0] sm:$0xff] }
 0x1de   : > { %v950_v57 = vpop.f32.mrf.mxu3 }
 0x1df   : > { %v3146_v1 = vadd.f32 %v950_v57, %v3136_v15 }
 0x1e1   : > { %1355 = vmatmul.f32.gmra.mxu2 %v3146_v1  ;;  %v677_v40 = vpop.f32.mrf.mxu0 }
 0x1e2   : > { %v3220_v28 = vadd.f32 %v3042_v32, %v677_v40 }
 0x1e3   : > { %1147 = vmatmul.f32.gmra.mxu3 %v1025_v3  ;;  %v1033_v3 = vunpack.c.h.bf16 %v2135_v24 }
 0x1e6   : > { %v953_v23 = vpop.f32.mrf.mxu3 }
 0x1e7   : > { %v3166_v60 = vadd.f32 %v953_v23, %v3156_v18 }
 0x1e9   : > { %1358 = vmatmul.f32.gmra.mxu2 %v3166_v60  ;;  %v1053_v58 = vpop.f32.mrf.mxu0 }
 0x1eb   : > { %1150 = vmatmul.f32.gmra.mxu3 %v1027_v25  ;;  %v1035_v25 = vunpack.c.h.bf16 %v2136_v39 }
 0x1ee   : > { %v956_v17 = vpop.f32.mrf.mxu3 }
 0x1ef   : > { %v3187_v41 = vadd.f32 %v956_v17, %v3177_v34 }
 0x1f1   : > { %1361 = vmatmul.f32.gmra.mxu2 %v3187_v41  ;;  %v1056_v11 = vpop.f32.mrf.mxu0 }
 0x1f3   : > { %1153 = vmatmul.f32.gmra.mxu3 %v1029_v43 }
 0x1f6   : > { %v959_v48 = vpop.f32.mrf.mxu3 }
 0x1f7   : > { %v3202_v2 = vadd.f32 %v959_v48, %v3199_v56  ;;  %v1612_v48 = vld [vmem:[#allocation3 + $0x1f0] sm:$0xff] }
 0x1f8   : > { %1615 = vmatpush.msra.mxu1 %v1612_v48  ;;  %v1609_v48 = vld [vmem:[#allocation3 + $0x1d8] sm:$0xff] }
 0x1f9   : > { %1364 = vmatmul.f32.gmra.mxu2 %v3202_v2  ;;  %v1059_v31 = vpop.f32.mrf.mxu0 }
 0x1fb   : > { %1156 = vmatmul.f32.gmra.mxu3 %v1031_v4 }
 0x1fe   : > { %v962_v10 = vpop.f32.mrf.mxu3 }
 0x1ff   : > { %v3209_v57 = vadd.f32 %v962_v10, %v3206_v8  ;;  %v1412_v10 = vld [vmem:[#allocation3 + $0x178] sm:$0xff] }
 0x200   : > { %1413 = vmatpush.msra.mxu0 %v1412_v10  ;;  %2178 = vmatpush.msrb.mxu2 %v1412_v10  ;;  %v1409_v10 = vld [vmem:[#allocation3 + $0x160] sm:$0xff] }
 0x201   : > { %1367 = vmatmul.f32.gmra.mxu2 %v3209_v57  ;;  %v1062_v43 = vpop.f32.mrf.mxu0 }
 0x203   : > { %1159 = vmatmul.f32.gmra.mxu3 %v1033_v3  ;;  %v1611_v3 = vld [vmem:[#allocation3 + $0x1e8] sm:$0xff] }
 0x204   : > { %1616 = vmatpush.msra.mxu1 %v1611_v3  ;;  %v1608_v3 = vld [vmem:[#allocation3 + $0x1d0] sm:$0xff] }
 0x206   : > { %v965_v23 = vpop.f32.mrf.mxu3  ;;  %1617 = vmatpush.msra.mxu1 %v1610_v20  ;;  %v1607_v20 = vld [vmem:[#allocation3 + $0x1c8] sm:$0xff] }
 0x207   : > { %v3216_v59 = vadd.f32 %v965_v23, %v3213_v50 }
 0x208   : > { %1618 = vmatpush.msra.mxu1 %v1609_v48  ;;  %v1606_v48 = vld [vmem:[#allocation3 + $0x1c0] sm:$0xff] }
 0x209   : > { %1370 = vmatmul.f32.gmra.mxu2 %v3216_v59  ;;  %v1065_v40 = vpop.f32.mrf.mxu0 }
 0x20a   : > { %1619 = vmatpush.msra.mxu1 %v1608_v3  ;;  %v1605_v3 = vld [vmem:[#allocation3 + $0x1b8] sm:$0xff] }
 0x20b   : > { %1162 = vmatmul.f32.gmra.mxu3 %v1035_v25 }
 0x20c   : > { %1620 = vmatpush.msra.mxu1 %v1607_v20 }
 0x20e   : > { %v968_v24 = vpop.f32.mrf.mxu3  ;;  %1621 = vmatpush.msra.mxu1 %v1606_v48 }
 0x20f   : > { %v3223_v17 = vadd.f32 %v968_v24, %v3220_v28  ;;  %v1411_v24 = vld [vmem:[#allocation3 + $0x170] sm:$0xff] }
 0x210   : > { %1414 = vmatpush.msra.mxu0 %v1411_v24  ;;  %2179 = vmatpush.msrb.mxu2 %v1411_v24  ;;  %v1408_v24 = vld [vmem:[#allocation3 + $0x158] sm:$0xff] }
 0x211   : > { %1373 = vmatmul.f32.gmra.mxu2 %v3223_v17  ;;  %v1068_v25 = vpop.f32.mrf.mxu0  ;;  %1622 = vmatpush.msra.mxu1 %v1605_v3 }
 0x213   : > { %1535 = vmatmul.f32.vlgmr.msra.gmra.mxu3 %v3065_v9 }
 0x216   : > { %v1118_v45 = vpop.f32.mrf.mxu3 }
 0x217   : > { %v1119_v39 = vadd.f32 %v1118_v45, %v1053_v58 }
 0x219   : > { %2137 = vmatmul.msk.f32.vlgmr.msrb.gmra.mxu1 %vm566_vm0, %v1119_v39  ;;  %v1410_v39 = vld [vmem:[#allocation3 + $0x168] sm:$0xff] }
 0x21a   : > { %1415 = vmatpush.msra.mxu0 %v1410_v39  ;;  %2180 = vmatpush.msrb.mxu2 %v1410_v39  ;;  %v1407_v39 = vld [vmem:[#allocation3 + $0x150] sm:$0xff] }
 0x21b   : > { %1538 = vmatmul.f32.gmra.mxu3 %v3073_v21 }
 0x21c   : > { %1416 = vmatpush.msra.mxu0 %v1409_v10  ;;  %2181 = vmatpush.msrb.mxu2 %v1409_v10  ;;  %v1406_v10 = vld [vmem:[#allocation3 + $0x148] sm:$0xff] }
 0x21e   : > { %v1121_v32 = vpop.f32.mrf.mxu3  ;;  %1417 = vmatpush.msra.mxu0 %v1408_v24  ;;  %2182 = vmatpush.msrb.mxu2 %v1408_v24  ;;  %v1604_v24 = vld [vmem:[#allocation3 + $0x1b0] sm:$0xff] }
 0x21f   : > { %v1122_v4 = vadd.f32 %v1121_v32, %v1056_v11  ;;  %v1071_v32 = vpop.f32.mrf.mxu0  ;;  %1623 = vmatpush.msra.mxu1 %v1604_v24  ;;  %v1601_v24 = vld [vmem:[#allocation3 + $0x198] sm:$0xff] }
 0x220   : > { %1418 = vmatpush.msra.mxu0 %v1407_v39  ;;  %2183 = vmatpush.msrb.mxu2 %v1407_v39  ;;  %v1603_v39 = vld [vmem:[#allocation3 + $0x1a8] sm:$0xff] }
 0x221   : > { %2138 = vmatmul.msk.f32.gmra.mxu1 %vm566_vm0, %v1122_v4 }
 0x222   : > { %1419 = vmatpush.msra.mxu0 %v1406_v10  ;;  %2184 = vmatpush.msrb.mxu2 %v1406_v10  ;;  %v1602_v10 = vld [vmem:[#allocation3 + $0x1a0] sm:$0xff] }
 0x223   : > { %1541 = vmatmul.f32.gmra.mxu3 %v3081_v26  ;;  %1624 = vmatpush.msra.mxu1 %v1603_v39  ;;  %v1599_v39 = vld [vmem:[#allocation3 + $0x188] sm:$0xff] }
 0x225   : > { %1625 = vmatpush.msra.mxu1 %v1602_v10 }
 0x226   : > { %v1124_v23 = vpop.f32.mrf.mxu3 }
 0x227   : > { %v1125_v58 = vadd.f32 %v1124_v23, %v1059_v31  ;;  %1626 = vmatpush.msra.mxu1 %v1601_v24 }
 0x229   : > { %2139 = vmatmul.msk.f32.gmra.mxu1 %vm566_vm0, %v1125_v58 }
 0x22b   : > { %1544 = vmatmul.f32.gmra.mxu3 %v3089_v36 }
 0x22e   : > { %v1127_v11 = vpop.f32.mrf.mxu3 }
 0x22f   : > { %v1128_v45 = vadd.f32 %v1127_v11, %v1062_v43  ;;  %v1074_v43 = vpop.f32.mrf.mxu0 }
 0x231   : > { %2140 = vmatmul.msk.f32.gmra.mxu1 %vm566_vm0, %v1128_v45 }
 0x233   : > { %1547 = vmatmul.f32.gmra.mxu3 %v3097_v42 }
 0x236   : > { %v1130_v31 = vpop.f32.mrf.mxu3 }
 0x237   : > { %v1131_v4 = vadd.f32 %v1130_v31, %v1065_v40  ;;  %v1077_v11 = vpop.f32.mrf.mxu0 }
 0x239   : > { %2141 = vmatmul.msk.f32.gmra.mxu1 %vm566_vm0, %v1131_v4 }
 0x23b   : > { %1550 = vmatmul.f32.gmra.mxu3 %v3107_v47 }
 0x23e   : > { %v1133_v23 = vpop.f32.mrf.mxu3 }
 0x23f   : > { %v1134_v58 = vadd.f32 %v1133_v23, %v1068_v25  ;;  %v1080_v4 = vpop.f32.mrf.mxu0 }
 0x241   : > { %2142 = vmatmul.msk.f32.gmra.mxu1 %vm566_vm0, %v1134_v58  ;;  %v1405_v58 = vld [vmem:[#allocation3 + $0x140] sm:$0xff] }
 0x242   : > { %1420 = vmatpush.msra.mxu0 %v1405_v58  ;;  %2185 = vmatpush.msrb.mxu2 %v1405_v58  ;;  %v1401_v58 = vld [vmem:[#allocation3 + $0x120] sm:$0xff] }
 0x243   : > { %1553 = vmatmul.f32.gmra.mxu3 %v3125_v5 }
 0x246   : > { %v1136_v40 = vpop.f32.mrf.mxu3 }
 0x247   : > { %v1137_v45 = vadd.f32 %v1136_v40, %v1071_v32  ;;  %v1083_v20 = vpop.f32.mrf.mxu0 }
 0x249   : > { %2143 = vmatmul.msk.f32.gmra.mxu1 %vm566_vm0, %v1137_v45  ;;  %v1404_v45 = vld [vmem:[#allocation3 + $0x138] sm:$0xff] }
 0x24a   : > { %1421 = vmatpush.msra.mxu0 %v1404_v45  ;;  %2186 = vmatpush.msrb.mxu2 %v1404_v45  ;;  %v1398_v45 = vld [vmem:[#allocation3 + $0x108] sm:$0xff] }
 0x24b   : > { %1556 = vmatmul.f32.gmra.mxu3 %v3146_v1 }
 0x24e   : > { %v1139_v25 = vpop.f32.mrf.mxu3 }
 0x24f   : > { %v1140_v31 = vadd.f32 %v1139_v25, %v1074_v43 }
 0x251   : > { %2144 = vmatmul.msk.f32.gmra.mxu1 %vm566_vm0, %v1140_v31  ;;  %v1403_v31 = vld [vmem:[#allocation3 + $0x130] sm:$0xff] }
 0x252   : > { %1422 = vmatpush.msra.mxu0 %v1403_v31  ;;  %2187 = vmatpush.msrb.mxu2 %v1403_v31  ;;  %v1598_v31 = vld [vmem:[#allocation3 + $0x180] sm:$0xff] }
 0x253   : > { %1559 = vmatmul.f32.gmra.mxu3 %v3166_v60 }
 0x256   : > { %v1142_v32 = vpop.f32.mrf.mxu3 }
 0x257   : > { %v1143_v23 = vadd.f32 %v1142_v32, %v1077_v11  ;;  %v1086_v11 = vpop.f32.mrf.mxu0 }
 0x259   : > { %2145 = vmatmul.msk.f32.gmra.mxu1 %vm566_vm0, %v1143_v23 }
 0x25b   : > { %1562 = vmatmul.f32.gmra.mxu3 %v3187_v41 }
 0x25e   : > { %v1145_v43 = vpop.f32.mrf.mxu3 }
 0x25f   : > { %v1146_v40 = vadd.f32 %v1145_v43, %v1080_v4  ;;  %v1402_v4 = vld [vmem:[#allocation3 + $0x128] sm:$0xff]  ;;  %v1089_v32 = vpop.f32.mrf.mxu0  ;;  %v1399_v43 = vld [vmem:[#allocation3 + $0x110] sm:$0xff] }
 0x260   : > { %1423 = vmatpush.msra.mxu0 %v1402_v4  ;;  %2188 = vmatpush.msrb.mxu2 %v1402_v4 }
 0x261   : > { %2146 = vmatmul.msk.f32.gmra.mxu1 %vm566_vm0, %v1146_v40  ;;  %v1600_v40 = vld [vmem:[#allocation3 + $0x190] sm:$0xff] }
 0x262   : > { %1424 = vmatpush.msra.mxu0 %v1401_v58  ;;  %2189 = vmatpush.msrb.mxu2 %v1401_v58 }
 0x263   : > { %1565 = vmatmul.f32.gmra.mxu3 %v3202_v2  ;;  %1627 = vmatpush.msra.mxu1 %v1600_v40 }
 0x265   : > { %1628 = vmatpush.msra.mxu1 %v1599_v39 }
 0x266   : > { %v1148_v48 = vpop.f32.mrf.mxu3 }
 0x267   : > { %v1149_v25 = vadd.f32 %v1148_v48, %v1083_v20  ;;  %v1400_v20 = vld [vmem:[#allocation3 + $0x118] sm:$0xff]  ;;  %v1092_v10 = vpop.f32.mrf.mxu0  ;;  %1629 = vmatpush.msra.mxu1 %v1598_v31 }
 0x268   : > { %1425 = vmatpush.msra.mxu0 %v1400_v20  ;;  %2190 = vmatpush.msrb.mxu2 %v1400_v20 }
 0x269   : > { %2147 = vmatmul.msk.f32.gmra.mxu1 %vm566_vm0, %v1149_v25  ;;  %v1397_v25 = vld [vmem:[#allocation3 + $0x100] sm:$0xff] }
 0x26a   : > { %1426 = vmatpush.msra.mxu0 %v1399_v43  ;;  %2191 = vmatpush.msrb.mxu2 %v1399_v43 }
 0x26b   : > { %1568 = vmatmul.f32.gmra.mxu3 %v3209_v57 }
 0x26c   : > { %1427 = vmatpush.msra.mxu0 %v1398_v45  ;;  %2192 = vmatpush.msrb.mxu2 %v1398_v45 }
 0x26e   : > { %v1151_v3 = vpop.f32.mrf.mxu3  ;;  %1428 = vmatpush.msra.mxu0 %v1397_v25  ;;  %2193 = vmatpush.msrb.mxu2 %v1397_v25 }
 0x26f   : > { %v1152_v23 = vadd.f32 %v1151_v3, %v1086_v11 }
 0x270   : > { %1513 = vmatpush.msra.mxu2 %v3113_v63 }
 0x271   : > { %2148 = vmatmul.msk.f32.gmra.mxu1 %vm566_vm0, %v1152_v23 }
 0x272   : > { %1514 = vmatpush.msra.mxu2 %v3118_v0 }
 0x273   : > { %1571 = vmatmul.f32.gmra.mxu3 %v3216_v59 }
 0x274   : > { %1515 = vmatpush.msra.mxu2 %v3127_v35 }
 0x276   : > { %v1154_v11 = vpop.f32.mrf.mxu3  ;;  %1516 = vmatpush.msra.mxu2 %v3132_v13 }
 0x277   : > { %v1155_v48 = vadd.f32 %v1154_v11, %v1089_v32  ;;  %v1095_v32 = vpop.f32.mrf.mxu0 }
 0x278   : > { %1517 = vmatpush.msra.mxu2 %v3138_v30 }
 0x279   : > { %2149 = vmatmul.msk.f32.gmra.mxu1 %vm566_vm0, %v1155_v48 }
 0x27a   : > { %1518 = vmatpush.msra.mxu2 %v3141_v49 }
 0x27b   : > { %1574 = vmatmul.f32.gmra.mxu3 %v3223_v17 }
 0x27c   : > { %1519 = vmatpush.msra.mxu2 %v3148_v6 }
 0x27e   : > { %v1157_v4 = vpop.f32.mrf.mxu3  ;;  %1520 = vmatpush.msra.mxu2 %v3152_v14 }
 0x27f   : > { %v1158_v3 = vadd.f32 %v1157_v4, %v1092_v10  ;;  %v1098_v0 = vpop.f32.mrf.mxu0 }
 0x280   : > { %1521 = vmatpush.msra.mxu2 %v3158_v19 }
 0x281   : > { %2150 = vmatmul.msk.f32.gmra.mxu1 %vm566_vm0, %v1158_v3 }
 0x282   : > { %1522 = vmatpush.msra.mxu2 %v3161_v46 }
 0x284   : > { %1523 = vmatpush.msra.mxu2 %v3168_v27 }
 0x286   : > { %v1160_v23 = vpop.f32.mrf.mxu3  ;;  %1524 = vmatpush.msra.mxu2 %v3172_v33 }
 0x287   : > { %v1161_v63 = vadd.f32 %v1160_v23, %v1095_v32 }
 0x288   : > { %1525 = vmatpush.msra.mxu2 %v3179_v53 }
 0x289   : > { %2151 = vmatmul.msk.f32.gmra.mxu1 %vm566_vm0, %v1161_v63 }
 0x28a   : > { %1526 = vmatpush.msra.mxu2 %v3182_v37 }
 0x28c   : > { %1527 = vmatpush.msra.mxu2 %v3190_v44 }
 0x28e   : > { %v1163_v35 = vpop.f32.mrf.mxu3  ;;  %1528 = vmatpush.msra.mxu2 %v3194_v55 }
 0x28f   : > { %v1164_v13 = vadd.f32 %v1163_v35, %v1098_v0 }
 0x291   : > { %2152 = vmatmul.msk.f32.gmra.mxu1 %vm566_vm0, %v1164_v13 }
 0x296   : > { %v1231_v30 = vpop.f32.mrf.mxu1  ;;  %v1536_v25 = vpop.f32.mrf.mxu3 }
 0x297   : > { %v3272_v49 = vadd.f32 %v1231_v30, %v3045_v7 }
 0x299   : > { %3529 = vst [vmem:[#allocation11_spill] sm:$0xff] %v3272_v49  ;;  %1429 = vmatmul.f32.vlgmr.msra.gmra.mxu0 %v3272_v49  ;;  %1630 = vmatmul.f32.vlgmr.msra.gmra.mxu1 %v3272_v49 }
 0x29e   : > { %v1234_v6 = vpop.f32.mrf.mxu1  ;;  %v1539_v23 = vpop.f32.mrf.mxu3 }
 0x29f   : > { %v3278_v14 = vadd.f32 %v1234_v6, %v3053_v29  ;;  %v3371_v6 = vld [vmem:[%s3517_s7 + $0x1] ss:$0 sm:$0xff] }
 0x2a1   : > { %3530 = vst [vmem:[#allocation12_spill] sm:$0xff] %v3278_v14  ;;  %1432 = vmatmul.f32.gmra.mxu0 %v3278_v14  ;;  %1633 = vmatmul.f32.gmra.mxu1 %v3278_v14 }
 0x2a6   : > { %v1237_v19 = vpop.f32.mrf.mxu1 }
 0x2a7   : > { %v3283_v46 = vadd.f32 %v1237_v19, %v3061_v62  ;;  %v1542_v19 = vpop.f32.mrf.mxu3 }
 0x2a9   : > { %1435 = vmatmul.f32.gmra.mxu0 %v3283_v46  ;;  %1636 = vmatmul.f32.gmra.mxu1 %v3283_v46 }
 0x2ae   : > { %v1240_v7 = vpop.f32.mrf.mxu1 }
 0x2af   : > { %v3288_v27 = vadd.f32 %v1240_v7, %v3069_v16 }
 0x2b1   : > { %1438 = vmatmul.f32.gmra.mxu0 %v3288_v27  ;;  %1639 = vmatmul.f32.gmra.mxu1 %v3288_v27 }
 0x2b6   : > { %v1243_v29 = vpop.f32.mrf.mxu1 }
 0x2b7   : > { %v3293_v33 = vadd.f32 %v1243_v29, %v3077_v52  ;;  %v1583_v29 = vadd.f32 %v3371_v6, %v1536_v25 }
 0x2b9   : > { %1441 = vmatmul.f32.gmra.mxu0 %v3293_v33  ;;  %1642 = vmatmul.f32.gmra.mxu1 %v3293_v33 }
 0x2be   : > { %v1246_v62 = vpop.f32.mrf.mxu1 }
 0x2bf   : > { %v3298_v53 = vadd.f32 %v1246_v62, %v3085_v51 }
 0x2c1   : > { %1444 = vmatmul.f32.gmra.mxu0 %v3298_v53  ;;  %1645 = vmatmul.f32.gmra.mxu1 %v3298_v53 }
 0x2c6   : > { %v1249_v16 = vpop.f32.mrf.mxu1 }
 0x2c7   : > { %v3303_v37 = vadd.f32 %v1249_v16, %v3093_v38 }
 0x2c9   : > { %1447 = vmatmul.f32.gmra.mxu0 %v3303_v37  ;;  %1648 = vmatmul.f32.gmra.mxu1 %v3303_v37 }
 0x2ce   : > { %v1252_v52 = vpop.f32.mrf.mxu1 }
 0x2cf   : > { %v3308_v44 = vadd.f32 %v1252_v52, %v3101_v22 }
 0x2d1   : > { %1450 = vmatmul.f32.gmra.mxu0 %v3308_v44  ;;  %1651 = vmatmul.f32.gmra.mxu1 %v3308_v44 }
 0x2d6   : > { %v1255_v51 = vpop.f32.mrf.mxu1 }
 0x2d7   : > { %v3313_v55 = vadd.f32 %v1255_v51, %v3111_v61  ;;  %v1329_v61 = vpop.f32.mrf.mxu2 }
 0x2d9   : > { %1453 = vmatmul.f32.gmra.mxu0 %v3313_v55  ;;  %1654 = vmatmul.f32.gmra.mxu1 %v3313_v55 }
 0x2de   : > { %v1258_v38 = vpop.f32.mrf.mxu1 }
 0x2df   : > { %v3318_v58 = vadd.f32 %v1258_v38, %v3136_v15  ;;  %v1332_v40 = vpop.f32.mrf.mxu2 }
 0x2e1   : > { %1456 = vmatmul.f32.gmra.mxu0 %v3318_v58  ;;  %1657 = vmatmul.f32.gmra.mxu1 %v3318_v58 }
 0x2e6   : > { %v1261_v22 = vpop.f32.mrf.mxu1 }
 0x2e7   : > { %v3323_v24 = vadd.f32 %v1261_v22, %v3156_v18  ;;  %v1335_v11 = vpop.f32.mrf.mxu2 }
 0x2e9   : > { %1459 = vmatmul.f32.gmra.mxu0 %v3323_v24  ;;  %1660 = vmatmul.f32.gmra.mxu1 %v3323_v24 }
 0x2ee   : > { %v1264_v20 = vpop.f32.mrf.mxu1 }
 0x2ef   : > { %v3328_v43 = vadd.f32 %v1264_v20, %v3177_v34 }
 0x2f1   : > { %1462 = vmatmul.f32.gmra.mxu0 %v3328_v43  ;;  %1663 = vmatmul.f32.gmra.mxu1 %v3328_v43 }
 0x2f6   : > { %v1267_v15 = vpop.f32.mrf.mxu1 }
 0x2f7   : > { %v3333_v45 = vadd.f32 %v1267_v15, %v3199_v56  ;;  %v1338_v56 = vpop.f32.mrf.mxu2 }
 0x2f9   : > { %1465 = vmatmul.f32.gmra.mxu0 %v3333_v45  ;;  %1666 = vmatmul.f32.gmra.mxu1 %v3333_v45 }
 0x2fe   : > { %v1270_v18 = vpop.f32.mrf.mxu1 }
 0x2ff   : > { %v3338_v39 = vadd.f32 %v1270_v18, %v3206_v8  ;;  %v3353_v8 = vld [vmem:[%s3517_s7] ss:$0 sm:$0xff]  ;;  %v1341_v4 = vpop.f32.mrf.mxu2  ;;  %v1584_v18 = vadd.f32 %v3371_v6, %v1539_v23 }
 0x300   : > { %v1382_v7 = vadd.f32 %v3353_v8, %v1335_v11 }
 0x301   : > { %1468 = vmatmul.f32.gmra.mxu0 %v3338_v39  ;;  %1669 = vmatmul.f32.gmra.mxu1 %v3338_v39 }
 0x306   : > { %v1273_v34 = vpop.f32.mrf.mxu1 }
 0x307   : > { %v3343_v48 = vadd.f32 %v1273_v34, %v3213_v50  ;;  %v1380_v50 = vadd.f32 %v3353_v8, %v1329_v61  ;;  %v1344_v13 = vpop.f32.mrf.mxu2  ;;  %v1545_v61 = vpop.f32.mrf.mxu3 }
 0x309   : > { %1471 = vmatmul.f32.vlgmr.msrb.gmra.mxu2 %v3343_v48  ;;  %1672 = vmatmul.f32.gmra.mxu1 %v3343_v48 }
 0x30e   : > { %v1276_v31 = vpop.f32.mrf.mxu1 }
 0x30f   : > { %v3348_v10 = vadd.f32 %v1276_v31, %v3220_v28  ;;  %v1381_v28 = vadd.f32 %v3353_v8, %v1332_v40  ;;  %v3376_v38 = vpop.f32.mrf.mxu2  ;;  %v1383_v40 = vadd.f32 %v3353_v8, %v1338_v56 }
 0x311   : > { %1474 = vmatmul.f32.gmra.mxu2 %v3348_v10  ;;  %1675 = vmatmul.f32.gmra.mxu1 %v3348_v10 }
 0x316   : > { %v1430_v3 = vpop.f32.mrf.mxu0  ;;  %v3358_v32 = vpop.f32.mrf.mxu1 }
 0x317   : > { %v3360_v63 = vadd.f32 %v1430_v3, %v1380_v50 }
 0x319   : > { %1529 = vmatmul.f32.vlgmr.msra.gmra.mxu2 %v3049_v12  ;;  %v1386_v12 = vadd.f32 %v3353_v8, %v3376_v38 }
 0x31e   : > { %v1433_v0 = vpop.f32.mrf.mxu0  ;;  %v3364_v35 = vpop.f32.mrf.mxu1 }
 0x31f   : > { %v3366_v30 = vadd.f32 %v1433_v0, %v1381_v28  ;;  %v3380_v0 = vpop.f32.mrf.mxu2 }
 0x321   : > { %1532 = vmatmul.f32.gmra.mxu2 %v3057_v54 }
 0x326   : > { %v1436_v62 = vpop.f32.mrf.mxu0  ;;  %v1637_v16 = vpop.f32.mrf.mxu1 }
 0x327   : > { %v1480_v52 = vadd.f32 %v1436_v62, %v1382_v7  ;;  %v1681_v51 = vadd.f32 %v1637_v16, %v1583_v29  ;;  %v1384_v16 = vadd.f32 %v3353_v8, %v1341_v4  ;;  %v1385_v4 = vadd.f32 %v3353_v8, %v1344_v13 }
 0x329   : > { %v1697_v22 = vmax.f32 %v1480_v52, %v1681_v51 }
 0x32b   : > { %v1713_v20 = vsub.f32 %v1480_v52, %v1697_v22  ;;  %v1777_v15 = vsub.f32 %v1681_v51, %v1697_v22  ;;  %v1548_v52 = vpop.f32.mrf.mxu3  ;;  %v1585_v22 = vadd.f32 %v3371_v6, %v1542_v19 }
 0x32d   : > { %v1731_v34 = vmul.f32 1.442695, %v1713_v20  ;;  %v1795_v31 = vmul.f32 1.442695, %v1777_v15 }
 0x32e   : > { %v1439_v50 = vpop.f32.mrf.mxu0  ;;  %v1640_v11 = vpop.f32.mrf.mxu1 }
 0x32f   : > { %2267 = vpow2.f32 %v1731_v34  ;;  %v1481_v25 = vadd.f32 %v1439_v50, %v1383_v40  ;;  %v1682_v3 = vadd.f32 %v1640_v11, %v1584_v18 }
 0x330   : > { %2269 = vpow2.f32 %v1795_v31 }
 0x331   : > { %v1698_v28 = vmax.f32 %v1481_v25, %v1682_v3 }
 0x333   : > { %v1714_v7 = vsub.f32 %v1481_v25, %v1698_v28  ;;  %v1778_v29 = vsub.f32 %v1682_v3, %v1698_v28  ;;  %v3385_v3 = vpop.f32.mrf.mxu2  ;;  %v1586_v28 = vadd.f32 %v3371_v6, %v1545_v61 }
 0x335   : > { %v2268_v62 = vpop.eup %2267  ;;  %v1733_v56 = vmul.f32 1.442695, %v1714_v7  ;;  %v1797_v51 = vmul.f32 1.442695, %v1778_v29 }
 0x336   : > { %v2270_v23 = vpop.eup %2269  ;;  %v1442_v20 = vpop.f32.mrf.mxu0 }
 0x337   : > { %v1643_v15 = vpop.f32.mrf.mxu1  ;;  %v1825_v34 = vadd.f32 %v2270_v23, %v2268_v62  ;;  %2271 = vpow2.f32 %v1733_v56  ;;  %v1482_v40 = vadd.f32 %v1442_v20, %v1384_v16 }
 0x338   : > { %2273 = vpow2.f32 %v1797_v51  ;;  %v1683_v18 = vadd.f32 %v1643_v15, %v1585_v22  ;;  %v1551_v51 = vpop.f32.mrf.mxu3 }
 0x339   : > { %2275 = vrcp.f32 %v1825_v34 }
 0x33a   : > { %v1699_v31 = vmax.f32 %v1482_v40, %v1683_v18 }
 0x33c   : > { %v1715_v50 = vsub.f32 %v1482_v40, %v1699_v31  ;;  %v1779_v11 = vsub.f32 %v1683_v18, %v1699_v31  ;;  %v1761_v40 = vmul.f32 %v2268_v62, %v3065_v9  ;;  %v1841_v18 = vmul.f32 %v2270_v23, %v3283_v46 }
 0x33d   : > { %v2272_v25 = vpop.eup %2271 }
 0x33e   : > { %v2274_v7 = vpop.eup %2273  ;;  %v1735_v19 = vmul.f32 1.442695, %v1715_v50  ;;  %v1799_v29 = vmul.f32 1.442695, %v1779_v11  ;;  %v1445_v14 = vpop.f32.mrf.mxu0  ;;  %v1857_v54 = vadd.f32 %v1841_v18, %v1761_v40  ;;  %v1762_v38 = vmul.f32 %v2272_v25, %v3073_v21 }
 0x33f   : > { %v1646_v56 = vpop.f32.mrf.mxu1  ;;  %v2276_v16 = vpop.eup %2275  ;;  %v1826_v22 = vadd.f32 %v2274_v7, %v2272_v25  ;;  %v1483_v20 = vadd.f32 %v1445_v14, %v1385_v4  ;;  %v1587_v14 = vadd.f32 %v3371_v6, %v1548_v52  ;;  %v1842_v52 = vmul.f32 %v2274_v7, %v3288_v27 }
 0x340   : > { %v1684_v15 = vadd.f32 %v1646_v56, %v1586_v28  ;;  %v1889_v13 = vmul.f32 %v2276_v16, %v1825_v34  ;;  %2277 = vpow2.f32 %v1735_v19  ;;  %v3394_v19 = vpop.f32.mrf.mxu2  ;;  %v1588_v27 = vadd.f32 %v3371_v6, %v1551_v51 }
 0x341   : > { %2279 = vrcp.f32 %v1826_v22 }
 0x342   : > { %v1700_v31 = vmax.f32 %v1483_v20, %v1684_v15  ;;  %v1905_v61 = vsub.f32 2.0, %v1889_v13  ;;  %2281 = vpow2.f32 %v1799_v29  ;;  %v1858_v13 = vadd.f32 %v1842_v52, %v1762_v38 }
 0x344   : > { %v1716_v50 = vsub.f32 %v1483_v20, %v1700_v31  ;;  %v1780_v11 = vsub.f32 %v1684_v15, %v1700_v31  ;;  %v1921_v49 = vmul.f32 %v2276_v16, %v1905_v61 }
 0x346   : > { %v1737_v4 = vmul.f32 1.442695, %v1716_v50  ;;  %v1801_v9 = vmul.f32 1.442695, %v1780_v11  ;;  %v2278_v62 = vpop.eup %2277  ;;  %v1937_v46 = vmul.f32 %v1921_v49, %v1857_v54  ;;  %v1448_v23 = vpop.f32.mrf.mxu0  ;;  %v1387_v50 = vadd.f32 %v3353_v8, %v3380_v0 }
 0x347   : > { %v1649_v34 = vpop.f32.mrf.mxu1  ;;  %v2280_v28 = vpop.eup %2279  ;;  %v1484_v29 = vadd.f32 %v1448_v23, %v1386_v12  ;;  %v1763_v0 = vmul.f32 %v2278_v62, %v3081_v26 }
 0x348   : > { %2283 = vpow2.f32 %v1737_v4  ;;  %v1685_v56 = vadd.f32 %v1649_v34, %v1587_v14  ;;  %v2282_v20 = vpop.eup %2281  ;;  %1953 = vst [vmem:[%s3396_s26 + $0x10] sm:$0xff] %v1937_v46  ;;  %v1890_v16 = vmul.f32 %v2280_v28, %v1826_v22  ;;  %v1554_v54 = vpop.f32.mrf.mxu3 }
 0x349   : > { %2285 = vpow2.f32 %v1801_v9  ;;  %v1827_v49 = vadd.f32 %v2282_v20, %v2278_v62  ;;  %v3405_v34 = vpop.f32.mrf.mxu2 }
 0x34a   : > { %v1701_v15 = vmax.f32 %v1484_v29, %v1685_v56  ;;  %v1906_v40 = vsub.f32 2.0, %v1890_v16 }
 0x34b   : > { %2287 = vrcp.f32 %v1827_v49 }
 0x34c   : > { %v1717_v18 = vsub.f32 %v1484_v29, %v1701_v15  ;;  %v1781_v12 = vsub.f32 %v1685_v56, %v1701_v15  ;;  %v1922_v31 = vmul.f32 %v2280_v28, %v1906_v40  ;;  %v1843_v28 = vmul.f32 %v2282_v20, %v3293_v33 }
 0x34d   : > { %v1388_v40 = vadd.f32 %v3353_v8, %v3385_v3 }
 0x34e   : > { %v2284_v61 = vpop.eup %2283  ;;  %v1739_v11 = vmul.f32 1.442695, %v1717_v18  ;;  %v1803_v21 = vmul.f32 1.442695, %v1781_v12  ;;  %v1938_v7 = vmul.f32 %v1922_v31, %v1858_v13  ;;  %v1451_v22 = vpop.f32.mrf.mxu0  ;;  %v1589_v18 = vadd.f32 %v3371_v6, %v1554_v54 }
 0x34f   : > { %v2286_v25 = vpop.eup %2285  ;;  %v1652_v14 = vpop.f32.mrf.mxu1  ;;  %v1485_v9 = vadd.f32 %v1451_v22, %v1387_v50  ;;  %v1859_v13 = vadd.f32 %v1843_v28, %v1763_v0 }
 0x350   : > { %v1828_v4 = vadd.f32 %v2286_v25, %v2284_v61  ;;  %2289 = vpow2.f32 %v1739_v11  ;;  %1954 = vst [vmem:[%s3396_s26 + $0x18] sm:$0xff] %v1938_v7  ;;  %v1686_v46 = vadd.f32 %v1652_v14, %v1588_v27  ;;  %v1557_v51 = vpop.f32.mrf.mxu3  ;;  %v1844_v22 = vmul.f32 %v2286_v25, %v3298_v53 }
 0x351   : > { %2291 = vpow2.f32 %v1803_v21  ;;  %v2288_v23 = vpop.eup %2287 }
 0x352   : > { %2293 = vrcp.f32 %v1828_v4  ;;  %v1891_v29 = vmul.f32 %v2288_v23, %v1827_v49  ;;  %v1702_v56 = vmax.f32 %v1485_v9, %v1686_v46  ;;  %v1764_v49 = vmul.f32 %v2284_v61, %v3089_v36 }
 0x353   : > { %v1389_v36 = vadd.f32 %v3353_v8, %v3394_v19  ;;  %v1590_v61 = vadd.f32 %v3371_v6, %v1557_v51 }
 0x354   : > { %v1907_v38 = vsub.f32 2.0, %v1891_v29  ;;  %v1718_v52 = vsub.f32 %v1485_v9, %v1702_v56  ;;  %v1782_v16 = vsub.f32 %v1686_v46, %v1702_v56  ;;  %v1362_v9 = vpop.f32.mrf.mxu2  ;;  %v1860_v0 = vadd.f32 %v1844_v22, %v1764_v49 }
 0x356   : > { %v2290_v15 = vpop.eup %2289  ;;  %v1923_v31 = vmul.f32 %v2288_v23, %v1907_v38  ;;  %v1741_v50 = vmul.f32 1.442695, %v1718_v52  ;;  %v1805_v26 = vmul.f32 1.442695, %v1782_v16  ;;  %v1454_v62 = vpop.f32.mrf.mxu0 }
 0x357   : > { %v2292_v12 = vpop.eup %2291  ;;  %v1655_v33 = vpop.f32.mrf.mxu1  ;;  %v1486_v21 = vadd.f32 %v1454_v62, %v1388_v40 }
 0x358   : > { %v2294_v20 = vpop.eup %2293  ;;  %v1829_v11 = vadd.f32 %v2292_v12, %v2290_v15  ;;  %v1687_v27 = vadd.f32 %v1655_v33, %v1589_v18  ;;  %v1939_v7 = vmul.f32 %v1923_v31, %v1859_v13  ;;  %2295 = vpow2.f32 %v1741_v50  ;;  %v1560_v29 = vpop.f32.mrf.mxu3 }
 0x359   : > { %v1892_v3 = vmul.f32 %v2294_v20, %v1828_v4  ;;  %v1765_v31 = vmul.f32 %v2290_v15, %v3097_v42  ;;  %v1845_v50 = vmul.f32 %v2292_v12, %v3303_v37  ;;  %v1591_v37 = vadd.f32 %v3371_v6, %v1560_v29 }
 0x35a   : > { %2297 = vrcp.f32 %v1829_v11  ;;  %v1703_v54 = vmax.f32 %v1486_v21, %v1687_v27  ;;  %1955 = vst [vmem:[%s3396_s26 + $0x20] sm:$0xff] %v1939_v7  ;;  %v1390_v7 = vadd.f32 %v3353_v8, %v3405_v34 }
 0x35b   : > { %v1908_v14 = vsub.f32 2.0, %v1892_v3  ;;  %2299 = vpow2.f32 %v1805_v26  ;;  %v1861_v49 = vadd.f32 %v1845_v50, %v1765_v31 }
 0x35c   : > { %v1719_v46 = vsub.f32 %v1486_v21, %v1703_v54  ;;  %v1783_v23 = vsub.f32 %v1687_v27, %v1703_v54  ;;  %v1365_v22 = vpop.f32.mrf.mxu2 }
 0x35d   : > { %v1924_v28 = vmul.f32 %v2294_v20, %v1908_v14 }
 0x35e   : > { %v1743_v53 = vmul.f32 1.442695, %v1719_v46  ;;  %v1807_v25 = vmul.f32 1.442695, %v1783_v23  ;;  %v2296_v4 = vpop.eup %2295  ;;  %v1457_v38 = vpop.f32.mrf.mxu0 }
 0x35f   : > { %v1940_v56 = vmul.f32 %v1924_v28, %v1860_v0  ;;  %v1658_v52 = vpop.f32.mrf.mxu1  ;;  %v1487_v40 = vadd.f32 %v1457_v38, %v1389_v36  ;;  %v1766_v34 = vmul.f32 %v2296_v4, %v3107_v47 }
 0x360   : > { %v2298_v16 = vpop.eup %2297  ;;  %2301 = vpow2.f32 %v1743_v53  ;;  %v1688_v18 = vadd.f32 %v1658_v52, %v1590_v61  ;;  %v1563_v14 = vpop.f32.mrf.mxu3  ;;  %v1391_v52 = vadd.f32 %v3353_v8, %v1362_v9 }
 0x361   : > { %v2300_v13 = vpop.eup %2299  ;;  %1956 = vst [vmem:[%s3396_s26 + $0x28] sm:$0xff] %v1940_v56  ;;  %v1893_v19 = vmul.f32 %v2298_v16, %v1829_v11  ;;  %2303 = vpow2.f32 %v1807_v25 }
 0x362   : > { %v1830_v51 = vadd.f32 %v2300_v13, %v2296_v4  ;;  %v1704_v26 = vmax.f32 %v1487_v40, %v1688_v18  ;;  %v1846_v36 = vmul.f32 %v2300_v13, %v3308_v44 }
 0x363   : > { %v1909_v62 = vsub.f32 2.0, %v1893_v19 }
 0x364   : > { %2305 = vrcp.f32 %v1830_v51  ;;  %v1720_v33 = vsub.f32 %v1487_v40, %v1704_v26  ;;  %v1784_v20 = vsub.f32 %v1688_v18, %v1704_v26  ;;  %v1862_v18 = vadd.f32 %v1846_v36, %v1766_v34 }
 0x365   : > { %v1925_v21 = vmul.f32 %v2298_v16, %v1909_v62  ;;  %v1592_v16 = vadd.f32 %v3371_v6, %v1563_v14 }
 0x366   : > { %v2302_v27 = vpop.eup %2301  ;;  %v1745_v3 = vmul.f32 1.442695, %v1720_v33  ;;  %v1809_v42 = vmul.f32 1.442695, %v1784_v20  ;;  %v1460_v11 = vpop.f32.mrf.mxu0 }
 0x367   : > { %v2304_v15 = vpop.eup %2303  ;;  %v1941_v12 = vmul.f32 %v1925_v21, %v1861_v49  ;;  %v1661_v54 = vpop.f32.mrf.mxu1  ;;  %v1488_v23 = vadd.f32 %v1460_v11, %v1390_v7  ;;  %v1767_v44 = vmul.f32 %v2302_v27, %v3125_v5 }
 0x368   : > { %v1831_v46 = vadd.f32 %v2304_v15, %v2302_v27  ;;  %2307 = vpow2.f32 %v1745_v3  ;;  %v1689_v0 = vadd.f32 %v1661_v54, %v1591_v37  ;;  %v1368_v33 = vpop.f32.mrf.mxu2  ;;  %v1847_v9 = vmul.f32 %v2304_v15, %v3313_v55  ;;  %v1566_v21 = vpop.f32.mrf.mxu3 }
 0x369   : > { %1957 = vst [vmem:[%s3396_s26 + $0x30] sm:$0xff] %v1941_v12  ;;  %2309 = vpow2.f32 %v1809_v42  ;;  %v1392_v27 = vadd.f32 %v3353_v8, %v1365_v22  ;;  %v1593_v11 = vadd.f32 %v3371_v6, %v1566_v21 }
 0x36a   : > { %v2306_v28 = vpop.eup %2305  ;;  %2311 = vrcp.f32 %v1831_v46  ;;  %v1705_v53 = vmax.f32 %v1488_v23, %v1689_v0  ;;  %v1863_v12 = vadd.f32 %v1847_v9, %v1767_v44 }
 0x36b   : > { %v1894_v61 = vmul.f32 %v2306_v28, %v1830_v51 }
 0x36c   : > { %v1721_v29 = vsub.f32 %v1488_v23, %v1705_v53  ;;  %v1785_v56 = vsub.f32 %v1689_v0, %v1705_v53 }
 0x36d   : > { %v1910_v25 = vsub.f32 2.0, %v1894_v61 }
 0x36e   : > { %v2308_v38 = vpop.eup %2307  ;;  %v1747_v50 = vmul.f32 1.442695, %v1721_v29  ;;  %v1811_v19 = vmul.f32 1.442695, %v1785_v56  ;;  %v1463_v26 = vpop.f32.mrf.mxu0 }
 0x36f   : > { %v2310_v40 = vpop.eup %2309  ;;  %v1926_v31 = vmul.f32 %v2306_v28, %v1910_v25  ;;  %v1664_v47 = vpop.f32.mrf.mxu1  ;;  %v1489_v51 = vadd.f32 %v1463_v26, %v1391_v52  ;;  %v1768_v61 = vmul.f32 %v2308_v38, %v3146_v1 }
 0x370   : > { %v2312_v4 = vpop.eup %2311  ;;  %v1832_v13 = vadd.f32 %v2310_v40, %v2308_v38  ;;  %v1690_v62 = vadd.f32 %v1664_v47, %v1592_v16  ;;  %2313 = vpow2.f32 %v1747_v50  ;;  %v1848_v53 = vmul.f32 %v2310_v40, %v3318_v58  ;;  %v1371_v56 = vpop.f32.mrf.mxu2 }
 0x371   : > { %v1942_v20 = vmul.f32 %v1926_v31, %v1862_v18  ;;  %v1895_v49 = vmul.f32 %v2312_v4, %v1831_v46  ;;  %v1569_v16 = vpop.f32.mrf.mxu3  ;;  %v1393_v47 = vadd.f32 %v3353_v8, %v1368_v33 }
 0x372   : > { %2315 = vrcp.f32 %v1832_v13  ;;  %v1706_v7 = vmax.f32 %v1489_v51, %v1690_v62  ;;  %v1864_v50 = vadd.f32 %v1848_v53, %v1768_v61  ;;  %v1594_v58 = vadd.f32 %v3371_v6, %v1569_v16 }
 0x373   : > { %1958 = vst [vmem:[%s3396_s26 + $0x38] sm:$0xff] %v1942_v20  ;;  %v1911_v3 = vsub.f32 2.0, %v1895_v49  ;;  %2317 = vpow2.f32 %v1811_v19  ;;  %v1394_v61 = vadd.f32 %v3353_v8, %v1371_v56 }
 0x374   : > { %v1722_v42 = vsub.f32 %v1489_v51, %v1706_v7  ;;  %v1786_v37 = vsub.f32 %v1690_v62, %v1706_v7 }
 0x375   : > { %v1927_v5 = vmul.f32 %v2312_v4, %v1911_v3 }
 0x376   : > { %v1749_v54 = vmul.f32 1.442695, %v1722_v42  ;;  %v1813_v14 = vmul.f32 1.442695, %v1786_v37  ;;  %v2314_v55 = vpop.eup %2313  ;;  %v1466_v46 = vpop.f32.mrf.mxu0 }
 0x377   : > { %v1943_v15 = vmul.f32 %v1927_v5, %v1863_v12  ;;  %v1667_v23 = vpop.f32.mrf.mxu1  ;;  %v1490_v28 = vadd.f32 %v1466_v46, %v1392_v27  ;;  %v1769_v49 = vmul.f32 %v2314_v55, %v3166_v60 }
 0x378   : > { %v2316_v0 = vpop.eup %2315  ;;  %2319 = vpow2.f32 %v1749_v54  ;;  %v1691_v34 = vadd.f32 %v1667_v23, %v1593_v11  ;;  %v1374_v3 = vpop.f32.mrf.mxu2 }
 0x379   : > { %v2318_v36 = vpop.eup %2317  ;;  %1959 = vst [vmem:[%s3396_s26 + $0x40] sm:$0xff] %v1943_v15  ;;  %v1896_v25 = vmul.f32 %v2316_v0, %v1832_v13  ;;  %2321 = vpow2.f32 %v1813_v14  ;;  %v1572_v11 = vpop.f32.mrf.mxu3 }
 0x37a   : > { %v1833_v22 = vadd.f32 %v2318_v36, %v2314_v55  ;;  %v1707_v29 = vmax.f32 %v1490_v28, %v1691_v34  ;;  %v1849_v33 = vmul.f32 %v2318_v36, %v3323_v24  ;;  %v1595_v53 = vadd.f32 %v3371_v6, %v1572_v11 }
 0x37b   : > { %v1912_v52 = vsub.f32 2.0, %v1896_v25 }
 0x37c   : > { %2323 = vrcp.f32 %v1833_v22  ;;  %v1723_v18 = vsub.f32 %v1490_v28, %v1707_v29  ;;  %v1787_v31 = vsub.f32 %v1691_v34, %v1707_v29  ;;  %v1865_v54 = vadd.f32 %v1849_v33, %v1769_v49 }
 0x37d   : > { %v1928_v19 = vmul.f32 %v2316_v0, %v1912_v52 }
 0x37e   : > { %v2320_v26 = vpop.eup %2319  ;;  %v1751_v4 = vmul.f32 1.442695, %v1723_v18  ;;  %v1815_v1 = vmul.f32 1.442695, %v1787_v31  ;;  %v1469_v44 = vpop.f32.mrf.mxu0 }
 0x37f   : > { %v2322_v38 = vpop.eup %2321  ;;  %v1944_v40 = vmul.f32 %v1928_v19, %v1864_v50  ;;  %v1670_v13 = vpop.f32.mrf.mxu1  ;;  %v1491_v62 = vadd.f32 %v1469_v44, %v1393_v47  ;;  %v1770_v0 = vmul.f32 %v2320_v26, %v3187_v41 }
 0x380   : > { %v1834_v51 = vadd.f32 %v2322_v38, %v2320_v26  ;;  %2325 = vpow2.f32 %v1751_v4  ;;  %v1692_v20 = vadd.f32 %v1670_v13, %v1594_v58  ;;  %v1850_v24 = vmul.f32 %v2322_v38, %v3328_v43 }
 0x381   : > { %1960 = vst [vmem:[%s3396_s26 + $0x48] sm:$0xff] %v1944_v40  ;;  %2327 = vpow2.f32 %v1815_v1  ;;  %v1575_v19 = vpop.f32.mrf.mxu3  ;;  %v1395_v58 = vadd.f32 %v3353_v8, %v1374_v3 }
 0x382   : > { %v2324_v9 = vpop.eup %2323  ;;  %2329 = vrcp.f32 %v1834_v51  ;;  %v1708_v7 = vmax.f32 %v1491_v62, %v1692_v20  ;;  %v1866_v25 = vadd.f32 %v1850_v24, %v1770_v0  ;;  %v1596_v13 = vadd.f32 %v3371_v6, %v1575_v19 }
 0x383   : > { %v1897_v21 = vmul.f32 %v2324_v9, %v1833_v22 }
 0x384   : > { %v1724_v37 = vsub.f32 %v1491_v62, %v1708_v7  ;;  %v1788_v12 = vsub.f32 %v1692_v20, %v1708_v7 }
 0x385   : > { %v1913_v42 = vsub.f32 2.0, %v1897_v21 }
 0x386   : > { %v2326_v5 = vpop.eup %2325  ;;  %v1753_v15 = vmul.f32 1.442695, %v1724_v37  ;;  %v1817_v46 = vmul.f32 1.442695, %v1788_v12 }
 0x387   : > { %v2328_v27 = vpop.eup %2327  ;;  %v1929_v14 = vmul.f32 %v2324_v9, %v1913_v42  ;;  %v1673_v34 = vpop.f32.mrf.mxu1  ;;  %v1771_v26 = vmul.f32 %v2326_v5, %v3202_v2 }
 0x388   : > { %v2330_v23 = vpop.eup %2329  ;;  %v1835_v60 = vadd.f32 %v2328_v27, %v2326_v5  ;;  %2331 = vpow2.f32 %v1753_v15  ;;  %v1693_v41 = vadd.f32 %v1673_v34, %v1595_v53  ;;  %v1851_v47 = vmul.f32 %v2328_v27, %v3333_v45 }
 0x389   : > { %v1945_v55 = vmul.f32 %v1929_v14, %v1865_v54  ;;  %v1898_v28 = vmul.f32 %v2330_v23, %v1834_v51 }
 0x38a   : > { %2333 = vrcp.f32 %v1835_v60  ;;  %v1867_v20 = vadd.f32 %v1851_v47, %v1771_v26 }
 0x38b   : > { %1961 = vst [vmem:[%s3396_s26 + $0x50] sm:$0xff] %v1945_v55  ;;  %v1914_v36 = vsub.f32 2.0, %v1898_v28  ;;  %2335 = vpow2.f32 %v1817_v46 }
 0x38c   : > { %v1472_v29 = vpop.f32.mrf.mxu2 }
 0x38d   : > { %v1930_v22 = vmul.f32 %v2330_v23, %v1914_v36  ;;  %v1492_v52 = vadd.f32 %v1472_v29, %v1394_v61 }
 0x38e   : > { %v2332_v16 = vpop.eup %2331 }
 0x38f   : > { %v1946_v18 = vmul.f32 %v1930_v22, %v1866_v25  ;;  %v1709_v31 = vmax.f32 %v1492_v52, %v1693_v41  ;;  %v1676_v44 = vpop.f32.mrf.mxu1  ;;  %v1772_v42 = vmul.f32 %v2332_v16, %v3209_v57 }
 0x390   : > { %v2334_v43 = vpop.eup %2333  ;;  %v1694_v2 = vadd.f32 %v1676_v44, %v1596_v13 }
 0x391   : > { %v2336_v50 = vpop.eup %2335  ;;  %1962 = vst [vmem:[%s3396_s26 + $0x58] sm:$0xff] %v1946_v18  ;;  %v1899_v4 = vmul.f32 %v2334_v43, %v1835_v60  ;;  %v1725_v1 = vsub.f32 %v1492_v52, %v1709_v31  ;;  %v1789_v38 = vsub.f32 %v1693_v41, %v1709_v31 }
 0x392   : > { %v1836_v56 = vadd.f32 %v2336_v50, %v2332_v16  ;;  %v1852_v37 = vmul.f32 %v2336_v50, %v3338_v39 }
 0x393   : > { %v1915_v40 = vsub.f32 2.0, %v1899_v4  ;;  %v1755_v51 = vmul.f32 1.442695, %v1725_v1  ;;  %v1819_v62 = vmul.f32 1.442695, %v1789_v38 }
 0x394   : > { %2337 = vrcp.f32 %v1836_v56  ;;  %v1475_v49 = vpop.f32.mrf.mxu2  ;;  %v1868_v0 = vadd.f32 %v1852_v37, %v1772_v42  ;;  %v3533_v42 = vld [vmem:[#allocation10_spill] sm:$0xff] }
 0x395   : > { %v1931_v9 = vmul.f32 %v2334_v43, %v1915_v40  ;;  %2339 = vpow2.f32 %v1755_v51  ;;  %v1493_v45 = vadd.f32 %v1475_v49, %v1395_v58  ;;  %v3532_v49 = vld [vmem:[#allocation11_spill] sm:$0xff] }
 0x396   : > { %2341 = vpow2.f32 %v1819_v62 }
 0x397   : > { %v1947_v33 = vmul.f32 %v1931_v9, %v1867_v20  ;;  %v1710_v21 = vmax.f32 %v1493_v45, %v1694_v2 }
 0x399   : > { %1963 = vst [vmem:[%s3396_s26 + $0x60] sm:$0xff] %v1947_v33  ;;  %v1726_v8 = vsub.f32 %v1493_v45, %v1710_v21  ;;  %v1790_v3 = vsub.f32 %v1694_v2, %v1710_v21 }
 0x39a   : > { %v2338_v7 = vpop.eup %2337 }
 0x39b   : > { %v1900_v12 = vmul.f32 %v2338_v7, %v1836_v56  ;;  %v2340_v5 = vpop.eup %2339  ;;  %v1757_v27 = vmul.f32 1.442695, %v1726_v8  ;;  %v1821_v11 = vmul.f32 1.442695, %v1790_v3 }
 0x39c   : > { %v2342_v54 = vpop.eup %2341  ;;  %v1530_v15 = vpop.f32.mrf.mxu2  ;;  %v1773_v41 = vmul.f32 %v2340_v5, %v3216_v59 }
 0x39d   : > { %v1916_v14 = vsub.f32 2.0, %v1900_v12  ;;  %v1837_v46 = vadd.f32 %v2342_v54, %v2340_v5  ;;  %2343 = vpow2.f32 %v1757_v27  ;;  %v1581_v23 = vadd.f32 %v3371_v6, %v1530_v15  ;;  %v3534_v12 = vld [vmem:[#allocation12_spill] sm:$0xff] }
 0x39e   : > { %2345 = vpow2.f32 %v1821_v11  ;;  %v1853_v52 = vmul.f32 %v2342_v54, %v3343_v48 }
 0x39f   : > { %v1932_v60 = vmul.f32 %v2338_v7, %v1916_v14  ;;  %2347 = vrcp.f32 %v1837_v46  ;;  %v1679_v57 = vadd.f32 %v3358_v32, %v1581_v23 }
 0x3a0   : > { %v1869_v43 = vadd.f32 %v1853_v52, %v1773_v41 }
 0x3a1   : > { %v1948_v55 = vmul.f32 %v1932_v60, %v1868_v0  ;;  %v1695_v39 = vmax.f32 %v3360_v63, %v1679_v57 }
 0x3a3   : > { %1964 = vst [vmem:[%s3396_s26 + $0x68] sm:$0xff] %v1948_v55  ;;  %v2344_v24 = vpop.eup %2343  ;;  %v1711_v28 = vsub.f32 %v3360_v63, %v1695_v39  ;;  %v1775_v34 = vsub.f32 %v1679_v57, %v1695_v39 }
 0x3a4   : > { %v2346_v36 = vpop.eup %2345  ;;  %v1533_v61 = vpop.f32.mrf.mxu2  ;;  %v1774_v48 = vmul.f32 %v2344_v24, %v3223_v17 }
 0x3a5   : > { %v2348_v53 = vpop.eup %2347  ;;  %v1838_v25 = vadd.f32 %v2346_v36, %v2344_v24  ;;  %v1727_v22 = vmul.f32 1.442695, %v1711_v28  ;;  %v1791_v29 = vmul.f32 1.442695, %v1775_v34  ;;  %v1582_v32 = vadd.f32 %v3371_v6, %v1533_v61 }
 0x3a6   : > { %v1901_v16 = vmul.f32 %v2348_v53, %v1837_v46  ;;  %v1854_v6 = vmul.f32 %v2346_v36, %v3348_v10  ;;  %v3531_v10 = vld [vmem:[#allocation9_spill] sm:$0xff] }
 0x3a7   : > { %2349 = vrcp.f32 %v1838_v25  ;;  %v1680_v63 = vadd.f32 %v3364_v35, %v1582_v32 }
 0x3a8   : > { %v1917_v18 = vsub.f32 2.0, %v1901_v16  ;;  %2351 = vpow2.f32 %v1727_v22  ;;  %v1870_v44 = vadd.f32 %v1854_v6, %v1774_v48 }
 0x3a9   : > { %2353 = vpow2.f32 %v1791_v29  ;;  %v1696_v50 = vmax.f32 %v3366_v30, %v1680_v63 }
 0x3aa   : > { %v1933_v31 = vmul.f32 %v2348_v53, %v1917_v18 }
 0x3ab   : > { %v1712_v26 = vsub.f32 %v3366_v30, %v1696_v50  ;;  %v1776_v59 = vsub.f32 %v1680_v63, %v1696_v50 }
 0x3ac   : > { %v1949_v19 = vmul.f32 %v1933_v31, %v1869_v43 }
 0x3ad   : > { %v2350_v47 = vpop.eup %2349  ;;  %v1729_v1 = vmul.f32 1.442695, %v1712_v26  ;;  %v1793_v35 = vmul.f32 1.442695, %v1776_v59 }
 0x3ae   : > { %v2352_v4 = vpop.eup %2351  ;;  %1965 = vst [vmem:[%s3396_s26 + $0x70] sm:$0xff] %v1949_v19  ;;  %v1902_v56 = vmul.f32 %v2350_v47, %v1838_v25 }
 0x3af   : > { %v2354_v38 = vpop.eup %2353  ;;  %2355 = vpow2.f32 %v1729_v1  ;;  %v1759_v9 = vmul.f32 %v2352_v4, %v3531_v10 }
 0x3b0   : > { %v1918_v58 = vsub.f32 2.0, %v1902_v56  ;;  %v1823_v40 = vadd.f32 %v2354_v38, %v2352_v4  ;;  %2357 = vpow2.f32 %v1793_v35  ;;  %v1839_v2 = vmul.f32 %v2354_v38, %v3532_v49 }
 0x3b2   : > { %v1934_v30 = vmul.f32 %v2350_v47, %v1918_v58  ;;  %2359 = vrcp.f32 %v1823_v40  ;;  %v1855_v21 = vadd.f32 %v1839_v2, %v1759_v9 }
 0x3b4   : > { %v1950_v13 = vmul.f32 %v1934_v30, %v1870_v44 }
 0x3b5   : > { %v2356_v51 = vpop.eup %2355 }
 0x3b6   : > { %1966 = vst [vmem:[%s3396_s26 + $0x78] sm:$0xff] %v1950_v13  ;;  %v2358_v17 = vpop.eup %2357  ;;  %v1760_v37 = vmul.f32 %v2356_v51, %v3533_v42 }
 0x3b7   : > { %v1824_v20 = vadd.f32 %v2358_v17, %v2356_v51  ;;  %v1840_v5 = vmul.f32 %v2358_v17, %v3534_v12 }
 0x3b8   : > { %v2360_v62 = vpop.eup %2359 }
 0x3b9   : > { %v1887_v45 = vmul.f32 %v2360_v62, %v1823_v40  ;;  %2361 = vrcp.f32 %v1824_v20  ;;  %v1856_v54 = vadd.f32 %v1840_v5, %v1760_v37 }
 0x3bb   : > { %v1903_v33 = vsub.f32 2.0, %v1887_v45 }
 0x3bd   : > { %v1919_v7 = vmul.f32 %v2360_v62, %v1903_v33 }
 0x3bf   : > { %v1935_v8 = vmul.f32 %v1919_v7, %v1855_v21  ;;  %v2362_v3 = vpop.eup %2361 }
 0x3c0   : > { %v1888_v27 = vmul.f32 %v2362_v3, %v1824_v20 }
 0x3c1   : > { %1951 = vst [vmem:[%s3396_s26] sm:$0xff] %v1935_v8 }
 0x3c2   : > { %v1904_v11 = vsub.f32 2.0, %v1888_v27 }
 0x3c4   : > { %v1920_v14 = vmul.f32 %v2362_v3, %v1904_v11 }
 0x3c6   : > { %v1936_v15 = vmul.f32 %v1920_v14, %v1856_v54 }
 0x3c8   : > { %1952 = vst [vmem:[%s3396_s26 + $0x8] sm:$0xff] %v1936_v15 }
 0x3c9   : > { %2420 = shalt.err (!%p2417_p11)
}
 0x3ca   : > { %s2464_s21 = smov 128   ;;  %s2465_s26 = smov 8  }
 0x3cb   : > { %2214 = dma.vmem_to_hbm [thread:$0]  (%p2554_p6), %s1981_s12, 2048, %s1983_s22, %s1968_s9, %s2464_s21, %s2464_s21, %s2465_s26  }
 0x3cc PF: > { %s1997_s19 = sand.u32 1, %s2447_s27   ;;  %p2221_p12 = pnand %p2078_p1, %p2560_p10 }
 0x3cd   : > { %s1998_s20 = scalar_lea.sflag [#allocation5], %s1997_s19 }
 0x3ce   : > { %p2222_p13 = pneg %p2221_p12 }
 0x3d0   : > { %2442 = dma.done.wait (%p2222_p13), %s1998_s20, 2048  }
 0x3d1   : > { %2444 = vsyncadd (%p2222_p13), %s1998_s20, 4294965248  ;;  %p19_p0 = scmp.ge.s32.totalorder %s2536_s11, 4   ;;  %s3535_s27 = smov %s2451_s28 }
 0x3d2   : > { %s3536_s28 = smov %s2455_s29  ;;  %s3537_s29 = smov %s2548_s14 }
 0x3d3   : > { %s3538_s30 = smov %s2536_s11  ;;  %21 = sbr.rel (!%p19_p0) target bundleno = 4 (0x4), region = 143 }
 0x3d8   :  { %2004 = vsyncpa [#allocation4], 1 }
 0x3d9   :  { %2006 = vsyncpa [#allocation4 + $0x1], 1 }
 0x3da   :  { %2007 = vsyncpa [#allocation5], 1 }
 0x3db   :  { %2009 = vsyncpa [#allocation5 + $0x1], 1 }

</bundles_post_ra>
